<compile_context>
chip_gen: v7x
topology: tpu7x:2x2x1
jax: 0.10.0
libtpu: 0.0.40
codegen_flags: <defaults>
</compile_context>

<pallas_src>
import functools

import jax
import jax.numpy as jnp
from jax import lax
from jax.experimental import pallas as pl
from jax.experimental.pallas import tpu as pltpu


_VMEM_BUDGET = 40 << 20      # target working-set bound (fits v7x 64 MiB physical)
_FUSED_WD_LIMIT = 12 << 20   # fuse decoder if double-buffered Wd stays under this


def _round_up(x, m):
    return (x + m - 1) // m * m


def _unroll_for(tc):
    """Partial unroll for the in-kernel time loop (LLO scheduler visibility)."""
    if tc <= 8:
        return max(tc, 1)
    for u in (8, 4, 2):
        if tc % u == 0:
            return u
    return 1


def _pick_time_chunk(seq, tc_cap):
    """Largest Tc <= tc_cap (and <= 64) that minimizes seq padding."""
    tc_cap = max(1, min(seq, tc_cap))
    lo = min(tc_cap, max(1, min(seq, 16)))
    best_tc, best_waste = lo, (-seq) % lo
    for tc in range(lo, tc_cap + 1):
        waste = (-seq) % tc
        if waste < best_waste or (waste == best_waste and tc > best_tc):
            best_tc, best_waste = tc, waste
    return best_tc


# ------------------------------ Pallas kernels ------------------------------

def _cprnn_fused_kernel(xb_ref, xud_ref, va_ref, ct_ref, wd_ref, bd_ref,
                        logits_ref, h_ref):
    """Recurrence + fused decoder over one time chunk for one batch block.

    xb_ref    : (Tc, Bb, Rp)       B[token_t], rank padded to 128
    xud_ref   : (Tc, Bb, Hp)       U[token_t] + d, hidden padded
    va_ref    : (Hp, Hp + Rp)      fused [V | A] (zero padded)
    ct_ref    : (Rp, Hp)           C^T (zero padded)
    wd_ref    : (Hp, Vp)           decoder weight (zero padded)
    bd_ref    : (1, Vp)            decoder bias
    logits_ref: (Tc, Bb, Vp)       output logits for this chunk
    h_ref     : (Bb, Hp)           VMEM scratch carrying h across time chunks
    """
    @pl.when(pl.program_id(1) == 0)
    def _():
        h_ref[...] = jnp.zeros_like(h_ref)

    hp = va_ref.shape[0]     # padded hidden (static, multiple of 128)
    tc = xb_ref.shape[0]     # timesteps in this chunk (static)

    va = va_ref[...]         # loop-invariant weights, hoisted
    ct = ct_ref[...]
    wd = wd_ref[...]
    bd = bd_ref[...]

    def step(i, h):
        # One fused MXU push for both h-dependent projections: h @ [V | A].
        hva = jnp.dot(h, va, preferred_element_type=jnp.float32)  # (Bb, Hp+Rp)
        # CP bilinear term: ((h@A) * (x@B)) @ C^T  (all lane-dense, exact)
        cp = jnp.dot(hva[:, hp:] * xb_ref[i], ct,
                     preferred_element_type=jnp.float32)
        h_new = jnp.tanh(cp + hva[:, :hp] + xud_ref[i])           # gate='tanh'
        # Fused decoder: off the h->h dependency chain, overlaps next step.
        logits_ref[i] = (jnp.dot(h_new, wd, preferred_element_type=jnp.float32)
                         + bd)
        return h_new

    h_ref[...] = lax.fori_loop(0, tc, step, h_ref[...], unroll=_unroll_for(tc))


def _cprnn_recurrence_kernel(xb_ref, xud_ref, va_ref, ct_ref, hseq_ref, h_ref):
    """Recurrence only (used when vocab is too large to keep Wd resident)."""
    @pl.when(pl.program_id(1) == 0)
    def _():
        h_ref[...] = jnp.zeros_like(h_ref)

    hp = va_ref.shape[0]
    tc = xb_ref.shape[0]
    va = va_ref[...]
    ct = ct_ref[...]

    def step(i, h):
        hva = jnp.dot(h, va, preferred_element_type=jnp.float32)
        cp = jnp.dot(hva[:, hp:] * xb_ref[i], ct,
                     preferred_element_type=jnp.float32)
        h_new = jnp.tanh(cp + hva[:, :hp] + xud_ref[i])
        hseq_ref[i] = h_new
        return h_new

    h_ref[...] = lax.fori_loop(0, tc, step, h_ref[...], unroll=_unroll_for(tc))


def _decoder_kernel(h_ref, w_ref, b_ref, o_ref):
    """Lane-dense GEMM tile: (tm, Hp) @ (Hp, tn) + (1, tn)."""
    o_ref[...] = (jnp.dot(h_ref[...], w_ref[...],
                          preferred_element_type=jnp.float32) + b_ref[...])


# ------------------------------ wrapper --------------------------------------

@functools.partial(jax.jit, static_argnames=("vocab_size",))
def cprnn_forward(tokens, params, vocab_size):
    """tokens: (batch, seq) int32. Returns logits (batch, seq, vocab) float32."""
    A, B, C, U, V, d, Wd, bd = (params["A"], params["B"], params["C"],
                                params["U"], params["V"], params["d"],
                                params["Wd"], params["bd"])
    batch, seq = tokens.shape
    hidden, rank = A.shape

    # --- lane-dense padded dims ----------------------------------------------
    Hp = _round_up(hidden, 128)
    Rp = _round_up(rank, 128)
    Vp = _round_up(vocab_size, 128)

    fused = 8 * Hp * Vp <= _FUSED_WD_LIMIT    # 2 buffers x 4 B of Wd

    # --- batch block: as big an MXU M as VMEM allows; 2 blocks on v7x ---------
    Bp = _round_up(batch, 8)
    kind = jax.devices()[0].device_kind.lower()
    n_tc = 2 if "v7" in kind else 1           # v7x: 2 TensorCores share the grid
    Bb = _round_up(pl.cdiv(Bp, n_tc), 8) if (n_tc > 1 and Bp >= 16) else Bp

    out_last = Vp if fused else Hp
    weights_b = 8 * (Hp * (Hp + Rp) + Rp * Hp)          # [V|A], C^T (2 buffers)
    if fused:
        weights_b += 8 * (Hp * Vp + Vp)                 # Wd, bd

    def _stream_b(tc, bb):
        return 8 * tc * bb * (Rp + Hp + out_last)       # xb + xud + out, 2 bufs

    while Bb > 8 and weights_b + _stream_b(1, Bb) + 4 * Bb * Hp > _VMEM_BUDGET:
        Bb = _round_up(Bb // 2, 8)
    Bp = _round_up(Bp, Bb)

    avail = _VMEM_BUDGET - weights_b - 4 * Bb * Hp
    tc_cap = max(1, min(64, avail // _stream_b(1, Bb))) if avail > 0 else 1
    Tc = _pick_time_chunk(seq, tc_cap)
    seq_p = _round_up(seq, Tc)

    vmem_needed = weights_b + _stream_b(Tc, Bb) + 4 * Bb * Hp
    vmem_limit = int(min(max(vmem_needed + (8 << 20), 32 << 20), 64 << 20))

    # --- pad the (small) weight tables BEFORE the gathers (exact, zero pad) ---
    tokens_p = jnp.pad(tokens, ((0, Bp - batch), (0, seq_p - seq)))
    tok_tm = tokens_p.T                                            # (seq_p, Bp)
    B_pad = jnp.pad(B, ((0, 0), (0, Rp - rank)))                   # (vocab, Rp)
    Ud_pad = jnp.pad(U + d[None, :], ((0, 0), (0, Hp - hidden)))   # (vocab, Hp)
    xb = jnp.take(B_pad, tok_tm, axis=0)                           # (seq_p, Bp, Rp)
    xud = jnp.take(Ud_pad, tok_tm, axis=0)                         # (seq_p, Bp, Hp)

    # --- zero-padded weights (exact) -------------------------------------------
    V_pad = jnp.pad(V, ((0, Hp - hidden), (0, Hp - hidden)))
    A_pad = jnp.pad(A, ((0, Hp - hidden), (0, Rp - rank)))
    VA = jnp.concatenate([V_pad, A_pad], axis=1)                   # (Hp, Hp + Rp)
    Ct_pad = jnp.pad(C.T, ((0, Rp - rank), (0, Hp - hidden)))      # (Rp, Hp)
    Wd_pad = jnp.pad(Wd, ((0, Hp - hidden), (0, Vp - vocab_size)))  # (Hp, Vp)
    bd_pad = jnp.pad(bd, (0, Vp - vocab_size)).reshape(1, Vp)

    grid = (Bp // Bb, seq_p // Tc)
    dim_sem = ("parallel", "arbitrary")

    if fused:
        # --- recurrence + decoder in one kernel: no hseq HBM round-trip -------
        logits_p = pl.pallas_call(
            _cprnn_fused_kernel,
            out_shape=jax.ShapeDtypeStruct((seq_p, Bp, Vp), jnp.float32),
            grid_spec=pltpu.PrefetchScalarGridSpec(
                num_scalar_prefetch=0,
                grid=grid,
                in_specs=[
                    pl.BlockSpec((Tc, Bb, Rp), lambda b, t: (t, b, 0)),   # xb
                    pl.BlockSpec((Tc, Bb, Hp), lambda b, t: (t, b, 0)),   # xud
                    pl.BlockSpec((Hp, Hp + Rp), lambda b, t: (0, 0)),     # [V|A]
                    pl.BlockSpec((Rp, Hp), lambda b, t: (0, 0)),          # C^T
                    pl.BlockSpec((Hp, Vp), lambda b, t: (0, 0)),          # Wd
                    pl.BlockSpec((1, Vp), lambda b, t: (0, 0)),           # bd
                ],
                out_specs=pl.BlockSpec((Tc, Bb, Vp), lambda b, t: (t, b, 0)),
                scratch_shapes=[pltpu.VMEM((Bb, Hp), jnp.float32)],
            ),
            compiler_params=pltpu.CompilerParams(
                dimension_semantics=dim_sem,
                vmem_limit_bytes=vmem_limit,
            ),
        )(xb, xud, VA, Ct_pad, Wd_pad, bd_pad)

        logits = logits_p[:seq, :batch, :vocab_size]
        return jnp.transpose(logits, (1, 0, 2))

    # --- fallback for very large vocab: recurrence, then vocab-tiled decoder --
    h_seq = pl.pallas_call(
        _cprnn_recurrence_kernel,
        out_shape=jax.ShapeDtypeStruct((seq_p, Bp, Hp), jnp.float32),
        grid_spec=pltpu.PrefetchScalarGridSpec(
            num_scalar_prefetch=0,
            grid=grid,
            in_specs=[
                pl.BlockSpec((Tc, Bb, Rp), lambda b, t: (t, b, 0)),
                pl.BlockSpec((Tc, Bb, Hp), lambda b, t: (t, b, 0)),
                pl.BlockSpec((Hp, Hp + Rp), lambda b, t: (0, 0)),
                pl.BlockSpec((Rp, Hp), lambda b, t: (0, 0)),
            ],
            out_specs=pl.BlockSpec((Tc, Bb, Hp), lambda b, t: (t, b, 0)),
            scratch_shapes=[pltpu.VMEM((Bb, Hp), jnp.float32)],
        ),
        compiler_params=pltpu.CompilerParams(
            dimension_semantics=dim_sem,
            vmem_limit_bytes=vmem_limit,
        ),
    )(xb, xud, VA, Ct_pad)

    M = seq_p * Bp
    hs = h_seq.reshape(M, Hp)
    tm = min(M, 512)
    Mp = _round_up(M, tm)
    if Mp != M:
        hs = jnp.pad(hs, ((0, Mp - M), (0, 0)))
    tn = min(Vp, 1024)
    Vp_dec = _round_up(Vp, tn)
    Wd_dec = jnp.pad(Wd_pad, ((0, 0), (0, Vp_dec - Vp)))
    bd_dec = jnp.pad(bd_pad, ((0, 0), (0, Vp_dec - Vp)))
    dec_needed = 8 * (tm * Hp + Hp * tn + tn + tm * tn)
    dec_limit = int(min(max(dec_needed + (8 << 20), 32 << 20), 64 << 20))

    logits_p = pl.pallas_call(
        _decoder_kernel,
        out_shape=jax.ShapeDtypeStruct((Mp, Vp_dec), jnp.float32),
        grid_spec=pltpu.PrefetchScalarGridSpec(
            num_scalar_prefetch=0,
            grid=(Mp // tm, Vp_dec // tn),
            in_specs=[
                pl.BlockSpec((tm, Hp), lambda i, j: (i, 0)),
                pl.BlockSpec((Hp, tn), lambda i, j: (0, j)),
                pl.BlockSpec((1, tn), lambda i, j: (0, j)),
            ],
            out_specs=pl.BlockSpec((tm, tn), lambda i, j: (i, j)),
        ),
        compiler_params=pltpu.CompilerParams(
            dimension_semantics=("parallel", "parallel"),
            vmem_limit_bytes=dec_limit,
        ),
    )(hs, Wd_dec, bd_dec)

    logits = logits_p[:M].reshape(seq_p, Bp, Vp_dec)[:seq, :batch, :vocab_size]
    return jnp.transpose(logits, (1, 0, 2))


# ------------------------------ reference (pure JAX) -------------------------

def cprnn_reference(tokens, params, vocab_size):
    A, B, C, U, V, d, Wd, bd = (params["A"], params["B"], params["C"],
                                params["U"], params["V"], params["d"],
                                params["Wd"], params["bd"])
    batch, seq = tokens.shape
    hidden = A.shape[0]
    x = jax.nn.one_hot(tokens.T, vocab_size, dtype=jnp.float32)  # (seq, batch, vocab)
    h = jnp.zeros((batch, hidden), jnp.float32)
    hs = []
    for t in range(seq):
        x_t = x[t]
        a_p = h @ A
        b_p = x_t @ B
        h = jnp.tanh(jnp.einsum("br,br,hr->bh", a_p, b_p, C) + h @ V + x_t @ U + d)
        hs.append(h)
    hseq = jnp.stack(hs, axis=0)                     # (seq, batch, hidden)
    logits = hseq @ Wd + bd                          # (seq, batch, vocab)
    return jnp.transpose(logits, (1, 0, 2))


# ------------------------------ main ------------------------------------------

if __name__ == "__main__":
    # Module config (use_embedding=False -> input_size = vocab_size)
    hidden_size = 32
    vocab_size = 16
    rank = 8
    batch = 2
    seq = 8

    stdv = 1.0 / (hidden_size ** 0.5)
    key = jax.random.PRNGKey(0)
    ks = jax.random.split(key, 9)
    uni = lambda k, shape: jax.random.uniform(k, shape, jnp.float32, -stdv, stdv)

    params = {
        "A": uni(ks[0], (hidden_size, rank)),
        "B": uni(ks[1], (vocab_size, rank)),
        "C": uni(ks[2], (hidden_size, rank)),
        "U": uni(ks[3], (vocab_size, hidden_size)),
        "V": uni(ks[4], (hidden_size, hidden_size)),
        "d": uni(ks[5], (hidden_size,)),
        # decoder Linear(hidden, vocab): stored pre-transposed for h @ Wd
        "Wd": uni(ks[6], (hidden_size, vocab_size)),
        "bd": uni(ks[7], (vocab_size,)),
    }

    tokens = jax.random.randint(ks[8], (batch, seq), 0, vocab_size, dtype=jnp.int32)

    out = cprnn_forward(tokens, params, vocab_size)
    out = jax.block_until_ready(out)

    ref = cprnn_reference(tokens, params, vocab_size)
    assert out.shape == (batch, seq, vocab_size), out.shape
    err = float(jnp.max(jnp.abs(out - ref)))
    assert jnp.allclose(out, ref, atol=3e-5, rtol=1e-5), err

    print("KERNEL_OK")
</pallas_src>

<mosaic_0001>
module attributes {stable_mosaic.version = 11 : i64} {
  func.func @_cprnn_fused_kernel(%arg0: i32, %arg1: i32, %arg2: memref<8x8x128xf32, #tpu.memory_space<vmem>>, %arg3: memref<8x8x128xf32, #tpu.memory_space<vmem>>, %arg4: memref<128x256xf32, #tpu.memory_space<vmem>>, %arg5: memref<128x128xf32, #tpu.memory_space<vmem>>, %arg6: memref<128x128xf32, #tpu.memory_space<vmem>>, %arg7: memref<1x128xf32, #tpu.memory_space<vmem>>, %arg8: memref<8x8x128xf32, #tpu.memory_space<vmem>>, %arg9: memref<8x128xf32, #tpu.memory_space<vmem>>) attributes {dimension_semantics = [#tpu.dimension_semantics<parallel>, #tpu.dimension_semantics<arbitrary>], iteration_bounds = array<i64: 1, 1>, scalar_prefetch = 0 : i64, scratch_operands = 1 : i64, tpu.core_type = #tpu.core_type<tc>, window_params = [{transform_indices = @transform_0, window_bounds = array<i64: 8, 8, 128>}, {transform_indices = @transform_1, window_bounds = array<i64: 8, 8, 128>}, {pipeline_mode = #tpu.pipeline_mode<synchronous>, transform_indices = @transform_2, window_bounds = array<i64: 128, 256>}, {pipeline_mode = #tpu.pipeline_mode<synchronous>, transform_indices = @transform_3, window_bounds = array<i64: 128, 128>}, {pipeline_mode = #tpu.pipeline_mode<synchronous>, transform_indices = @transform_4, window_bounds = array<i64: 128, 128>}, {pipeline_mode = #tpu.pipeline_mode<synchronous>, transform_indices = @transform_5, window_bounds = array<i64: 1, 128>}, {transform_indices = @transform_6, window_bounds = array<i64: 8, 8, 128>}]} {
    %c0_i32 = arith.constant 0 : i32
    %0 = arith.cmpi eq, %arg1, %c0_i32 : i32
    %1 = arith.extui %0 : i1 to i32
    %c0_i32_0 = arith.constant 0 : i32
    %2 = arith.cmpi ne, %1, %c0_i32_0 : i32
    scf.if %2 {
      %cst_84 = arith.constant 0.000000e+00 : f32
      %177 = vector.broadcast %cst_84 : f32 to vector<8x128xf32>
      %c0_85 = arith.constant 0 : index
      %c0_86 = arith.constant 0 : index
      %178 = vector.load %arg9[%c0_85, %c0_86] : memref<8x128xf32, #tpu.memory_space<vmem>>, vector<8x128xf32>
      tpu.vector_store %arg9[%c0_85, %c0_86], %177 {strides = array<i32>} : memref<8x128xf32, #tpu.memory_space<vmem>>, vector<8x128xf32>,
    } else {
    }
    %c0 = arith.constant 0 : index
    %c0_1 = arith.constant 0 : index
    %3 = vector.load %arg4[%c0, %c0_1] : memref<128x256xf32, #tpu.memory_space<vmem>>, vector<128x256xf32>
    %c0_2 = arith.constant 0 : index
    %c0_3 = arith.constant 0 : index
    %4 = vector.load %arg5[%c0_2, %c0_3] : memref<128x128xf32, #tpu.memory_space<vmem>>, vector<128x128xf32>
    %c0_4 = arith.constant 0 : index
    %c0_5 = arith.constant 0 : index
    %5 = vector.load %arg6[%c0_4, %c0_5] : memref<128x128xf32, #tpu.memory_space<vmem>>, vector<128x128xf32>
    %c0_6 = arith.constant 0 : index
    %c0_7 = arith.constant 0 : index
    %6 = vector.load %arg7[%c0_6, %c0_7] : memref<1x128xf32, #tpu.memory_space<vmem>>, vector<1x128xf32>
    %c0_8 = arith.constant 0 : index
    %c0_9 = arith.constant 0 : index
    %7 = vector.load %arg9[%c0_8, %c0_9] : memref<8x128xf32, #tpu.memory_space<vmem>>, vector<8x128xf32>
    %c0_i32_10 = arith.constant 0 : i32
    %cst = arith.constant dense<0.000000e+00> : vector<8x256xf32>
    %8 = tpu.matmul %7, %3, %cst {dimension_numbers = #tpu.dot_dimension_numbers<[1], [0], [0], [1], [0, 0, 1, 1], [], []>} : vector<8x128xf32>, vector<128x256xf32>, vector<8x256xf32> -> vector<8x256xf32>
    %9 = vector.extract_strided_slice %8 {offsets = [0, 128], sizes = [8, 128], strides = [1, 1]} : vector<8x256xf32> to vector<8x128xf32>
    %10 = arith.index_cast %c0_i32_10 : i32 to index
    %c0_11 = arith.constant 0 : index
    %c0_12 = arith.constant 0 : index
    %11 = vector.load %arg2[%10, %c0_11, %c0_12] : memref<8x8x128xf32, #tpu.memory_space<vmem>>, vector<1x8x128xf32>
    %12 = vector.shape_cast %11 : vector<1x8x128xf32> to vector<8x128xf32>
    %13 = arith.mulf %9, %12 : vector<8x128xf32>
    %cst_13 = arith.constant dense<0.000000e+00> : vector<8x128xf32>
    %14 = tpu.matmul %13, %4, %cst_13 {dimension_numbers = #tpu.dot_dimension_numbers<[1], [0], [0], [1], [0, 0, 1, 1], [], []>} : vector<8x128xf32>, vector<128x128xf32>, vector<8x128xf32> -> vector<8x128xf32>
    %15 = vector.extract_strided_slice %8 {offsets = [0, 0], sizes = [8, 128], strides = [1, 1]} : vector<8x256xf32> to vector<8x128xf32>
    %16 = arith.addf %14, %15 : vector<8x128xf32>
    %17 = arith.index_cast %c0_i32_10 : i32 to index
    %c0_14 = arith.constant 0 : index
    %c0_15 = arith.constant 0 : index
    %18 = vector.load %arg3[%17, %c0_14, %c0_15] : memref<8x8x128xf32, #tpu.memory_space<vmem>>, vector<1x8x128xf32>
    %19 = vector.shape_cast %18 : vector<1x8x128xf32> to vector<8x128xf32>
    %20 = arith.addf %16, %19 : vector<8x128xf32>
    %21 = math.tanh %20 : vector<8x128xf32>
    %cst_16 = arith.constant dense<0.000000e+00> : vector<8x128xf32>
    %22 = tpu.matmul %21, %5, %cst_16 {dimension_numbers = #tpu.dot_dimension_numbers<[1], [0], [0], [1], [0, 0, 1, 1], [], []>} : vector<8x128xf32>, vector<128x128xf32>, vector<8x128xf32> -> vector<8x128xf32>
    %23 = vector.broadcast %6 : vector<1x128xf32> to vector<8x128xf32>
    %24 = arith.addf %22, %23 : vector<8x128xf32>
    %25 = arith.index_cast %c0_i32_10 : i32 to index
    %c0_17 = arith.constant 0 : index
    %c0_18 = arith.constant 0 : index
    %26 = vector.load %arg8[%25, %c0_17, %c0_18] : memref<8x8x128xf32, #tpu.memory_space<vmem>>, vector<1x8x128xf32>
    %27 = vector.shape_cast %26 : vector<1x8x128xf32> to vector<8x128xf32>
    %28 = vector.shape_cast %24 : vector<8x128xf32> to vector<1x8x128xf32>
    tpu.vector_store %arg8[%25, %c0_17, %c0_18], %28 {strides = array<i32>} : memref<8x8x128xf32, #tpu.memory_space<vmem>>, vector<1x8x128xf32>,
    %c1_i32 = arith.constant 1 : i32
    %cst_19 = arith.constant dense<0.000000e+00> : vector<8x256xf32>
    %29 = tpu.matmul %21, %3, %cst_19 {dimension_numbers = #tpu.dot_dimension_numbers<[1], [0], [0], [1], [0, 0, 1, 1], [], []>} : vector<8x128xf32>, vector<128x256xf32>, vector<8x256xf32> -> vector<8x256xf32>
    %30 = vector.extract_strided_slice %29 {offsets = [0, 128], sizes = [8, 128], strides = [1, 1]} : vector<8x256xf32> to vector<8x128xf32>
    %31 = arith.index_cast %c1_i32 : i32 to index
    %c0_20 = arith.constant 0 : index
    %c0_21 = arith.constant 0 : index
    %32 = vector.load %arg2[%31, %c0_20, %c0_21] : memref<8x8x128xf32, #tpu.memory_space<vmem>>, vector<1x8x128xf32>
    %33 = vector.shape_cast %32 : vector<1x8x128xf32> to vector<8x128xf32>
    %34 = arith.mulf %30, %33 : vector<8x128xf32>
    %cst_22 = arith.constant dense<0.000000e+00> : vector<8x128xf32>
    %35 = tpu.matmul %34, %4, %cst_22 {dimension_numbers = #tpu.dot_dimension_numbers<[1], [0], [0], [1], [0, 0, 1, 1], [], []>} : vector<8x128xf32>, vector<128x128xf32>, vector<8x128xf32> -> vector<8x128xf32>
    %36 = vector.extract_strided_slice %29 {offsets = [0, 0], sizes = [8, 128], strides = [1, 1]} : vector<8x256xf32> to vector<8x128xf32>
    %37 = arith.addf %35, %36 : vector<8x128xf32>
    %38 = arith.index_cast %c1_i32 : i32 to index
    %c0_23 = arith.constant 0 : index
    %c0_24 = arith.constant 0 : index
    %39 = vector.load %arg3[%38, %c0_23, %c0_24] : memref<8x8x128xf32, #tpu.memory_space<vmem>>, vector<1x8x128xf32>
    %40 = vector.shape_cast %39 : vector<1x8x128xf32> to vector<8x128xf32>
    %41 = arith.addf %37, %40 : vector<8x128xf32>
    %42 = math.tanh %41 : vector<8x128xf32>
    %cst_25 = arith.constant dense<0.000000e+00> : vector<8x128xf32>
    %43 = tpu.matmul %42, %5, %cst_25 {dimension_numbers = #tpu.dot_dimension_numbers<[1], [0], [0], [1], [0, 0, 1, 1], [], []>} : vector<8x128xf32>, vector<128x128xf32>, vector<8x128xf32> -> vector<8x128xf32>
    %44 = vector.broadcast %6 : vector<1x128xf32> to vector<8x128xf32>
    %45 = arith.addf %43, %44 : vector<8x128xf32>
    %46 = arith.index_cast %c1_i32 : i32 to index
    %c0_26 = arith.constant 0 : index
    %c0_27 = arith.constant 0 : index
    %47 = vector.load %arg8[%46, %c0_26, %c0_27] : memref<8x8x128xf32, #tpu.memory_space<vmem>>, vector<1x8x128xf32>
    %48 = vector.shape_cast %47 : vector<1x8x128xf32> to vector<8x128xf32>
    %49 = vector.shape_cast %45 : vector<8x128xf32> to vector<1x8x128xf32>
    tpu.vector_store %arg8[%46, %c0_26, %c0_27], %49 {strides = array<i32>} : memref<8x8x128xf32, #tpu.memory_space<vmem>>, vector<1x8x128xf32>,
    %c2_i32 = arith.constant 2 : i32
    %cst_28 = arith.constant dense<0.000000e+00> : vector<8x256xf32>
    %50 = tpu.matmul %42, %3, %cst_28 {dimension_numbers = #tpu.dot_dimension_numbers<[1], [0], [0], [1], [0, 0, 1, 1], [], []>} : vector<8x128xf32>, vector<128x256xf32>, vector<8x256xf32> -> vector<8x256xf32>
    %51 = vector.extract_strided_slice %50 {offsets = [0, 128], sizes = [8, 128], strides = [1, 1]} : vector<8x256xf32> to vector<8x128xf32>
    %52 = arith.index_cast %c2_i32 : i32 to index
    %c0_29 = arith.constant 0 : index
    %c0_30 = arith.constant 0 : index
    %53 = vector.load %arg2[%52, %c0_29, %c0_30] : memref<8x8x128xf32, #tpu.memory_space<vmem>>, vector<1x8x128xf32>
    %54 = vector.shape_cast %53 : vector<1x8x128xf32> to vector<8x128xf32>
    %55 = arith.mulf %51, %54 : vector<8x128xf32>
    %cst_31 = arith.constant dense<0.000000e+00> : vector<8x128xf32>
    %56 = tpu.matmul %55, %4, %cst_31 {dimension_numbers = #tpu.dot_dimension_numbers<[1], [0], [0], [1], [0, 0, 1, 1], [], []>} : vector<8x128xf32>, vector<128x128xf32>, vector<8x128xf32> -> vector<8x128xf32>
    %57 = vector.extract_strided_slice %50 {offsets = [0, 0], sizes = [8, 128], strides = [1, 1]} : vector<8x256xf32> to vector<8x128xf32>
    %58 = arith.addf %56, %57 : vector<8x128xf32>
    %59 = arith.index_cast %c2_i32 : i32 to index
    %c0_32 = arith.constant 0 : index
    %c0_33 = arith.constant 0 : index
    %60 = vector.load %arg3[%59, %c0_32, %c0_33] : memref<8x8x128xf32, #tpu.memory_space<vmem>>, vector<1x8x128xf32>
    %61 = vector.shape_cast %60 : vector<1x8x128xf32> to vector<8x128xf32>
    %62 = arith.addf %58, %61 : vector<8x128xf32>
    %63 = math.tanh %62 : vector<8x128xf32>
    %cst_34 = arith.constant dense<0.000000e+00> : vector<8x128xf32>
    %64 = tpu.matmul %63, %5, %cst_34 {dimension_numbers = #tpu.dot_dimension_numbers<[1], [0], [0], [1], [0, 0, 1, 1], [], []>} : vector<8x128xf32>, vector<128x128xf32>, vector<8x128xf32> -> vector<8x128xf32>
    %65 = vector.broadcast %6 : vector<1x128xf32> to vector<8x128xf32>
    %66 = arith.addf %64, %65 : vector<8x128xf32>
    %67 = arith.index_cast %c2_i32 : i32 to index
    %c0_35 = arith.constant 0 : index
    %c0_36 = arith.constant 0 : index
    %68 = vector.load %arg8[%67, %c0_35, %c0_36] : memref<8x8x128xf32, #tpu.memory_space<vmem>>, vector<1x8x128xf32>
    %69 = vector.shape_cast %68 : vector<1x8x128xf32> to vector<8x128xf32>
    %70 = vector.shape_cast %66 : vector<8x128xf32> to vector<1x8x128xf32>
    tpu.vector_store %arg8[%67, %c0_35, %c0_36], %70 {strides = array<i32>} : memref<8x8x128xf32, #tpu.memory_space<vmem>>, vector<1x8x128xf32>,
    %c3_i32 = arith.constant 3 : i32
    %cst_37 = arith.constant dense<0.000000e+00> : vector<8x256xf32>
    %71 = tpu.matmul %63, %3, %cst_37 {dimension_numbers = #tpu.dot_dimension_numbers<[1], [0], [0], [1], [0, 0, 1, 1], [], []>} : vector<8x128xf32>, vector<128x256xf32>, vector<8x256xf32> -> vector<8x256xf32>
    %72 = vector.extract_strided_slice %71 {offsets = [0, 128], sizes = [8, 128], strides = [1, 1]} : vector<8x256xf32> to vector<8x128xf32>
    %73 = arith.index_cast %c3_i32 : i32 to index
    %c0_38 = arith.constant 0 : index
    %c0_39 = arith.constant 0 : index
    %74 = vector.load %arg2[%73, %c0_38, %c0_39] : memref<8x8x128xf32, #tpu.memory_space<vmem>>, vector<1x8x128xf32>
    %75 = vector.shape_cast %74 : vector<1x8x128xf32> to vector<8x128xf32>
    %76 = arith.mulf %72, %75 : vector<8x128xf32>
    %cst_40 = arith.constant dense<0.000000e+00> : vector<8x128xf32>
    %77 = tpu.matmul %76, %4, %cst_40 {dimension_numbers = #tpu.dot_dimension_numbers<[1], [0], [0], [1], [0, 0, 1, 1], [], []>} : vector<8x128xf32>, vector<128x128xf32>, vector<8x128xf32> -> vector<8x128xf32>
    %78 = vector.extract_strided_slice %71 {offsets = [0, 0], sizes = [8, 128], strides = [1, 1]} : vector<8x256xf32> to vector<8x128xf32>
    %79 = arith.addf %77, %78 : vector<8x128xf32>
    %80 = arith.index_cast %c3_i32 : i32 to index
    %c0_41 = arith.constant 0 : index
    %c0_42 = arith.constant 0 : index
    %81 = vector.load %arg3[%80, %c0_41, %c0_42] : memref<8x8x128xf32, #tpu.memory_space<vmem>>, vector<1x8x128xf32>
    %82 = vector.shape_cast %81 : vector<1x8x128xf32> to vector<8x128xf32>
    %83 = arith.addf %79, %82 : vector<8x128xf32>
    %84 = math.tanh %83 : vector<8x128xf32>
    %cst_43 = arith.constant dense<0.000000e+00> : vector<8x128xf32>
    %85 = tpu.matmul %84, %5, %cst_43 {dimension_numbers = #tpu.dot_dimension_numbers<[1], [0], [0], [1], [0, 0, 1, 1], [], []>} : vector<8x128xf32>, vector<128x128xf32>, vector<8x128xf32> -> vector<8x128xf32>
    %86 = vector.broadcast %6 : vector<1x128xf32> to vector<8x128xf32>
    %87 = arith.addf %85, %86 : vector<8x128xf32>
    %88 = arith.index_cast %c3_i32 : i32 to index
    %c0_44 = arith.constant 0 : index
    %c0_45 = arith.constant 0 : index
    %89 = vector.load %arg8[%88, %c0_44, %c0_45] : memref<8x8x128xf32, #tpu.memory_space<vmem>>, vector<1x8x128xf32>
    %90 = vector.shape_cast %89 : vector<1x8x128xf32> to vector<8x128xf32>
    %91 = vector.shape_cast %87 : vector<8x128xf32> to vector<1x8x128xf32>
    tpu.vector_store %arg8[%88, %c0_44, %c0_45], %91 {strides = array<i32>} : memref<8x8x128xf32, #tpu.memory_space<vmem>>, vector<1x8x128xf32>,
    %c4_i32 = arith.constant 4 : i32
    %cst_46 = arith.constant dense<0.000000e+00> : vector<8x256xf32>
    %92 = tpu.matmul %84, %3, %cst_46 {dimension_numbers = #tpu.dot_dimension_numbers<[1], [0], [0], [1], [0, 0, 1, 1], [], []>} : vector<8x128xf32>, vector<128x256xf32>, vector<8x256xf32> -> vector<8x256xf32>
    %93 = vector.extract_strided_slice %92 {offsets = [0, 128], sizes = [8, 128], strides = [1, 1]} : vector<8x256xf32> to vector<8x128xf32>
    %94 = arith.index_cast %c4_i32 : i32 to index
    %c0_47 = arith.constant 0 : index
    %c0_48 = arith.constant 0 : index
    %95 = vector.load %arg2[%94, %c0_47, %c0_48] : memref<8x8x128xf32, #tpu.memory_space<vmem>>, vector<1x8x128xf32>
    %96 = vector.shape_cast %95 : vector<1x8x128xf32> to vector<8x128xf32>
    %97 = arith.mulf %93, %96 : vector<8x128xf32>
    %cst_49 = arith.constant dense<0.000000e+00> : vector<8x128xf32>
    %98 = tpu.matmul %97, %4, %cst_49 {dimension_numbers = #tpu.dot_dimension_numbers<[1], [0], [0], [1], [0, 0, 1, 1], [], []>} : vector<8x128xf32>, vector<128x128xf32>, vector<8x128xf32> -> vector<8x128xf32>
    %99 = vector.extract_strided_slice %92 {offsets = [0, 0], sizes = [8, 128], strides = [1, 1]} : vector<8x256xf32> to vector<8x128xf32>
    %100 = arith.addf %98, %99 : vector<8x128xf32>
    %101 = arith.index_cast %c4_i32 : i32 to index
    %c0_50 = arith.constant 0 : index
    %c0_51 = arith.constant 0 : index
    %102 = vector.load %arg3[%101, %c0_50, %c0_51] : memref<8x8x128xf32, #tpu.memory_space<vmem>>, vector<1x8x128xf32>
    %103 = vector.shape_cast %102 : vector<1x8x128xf32> to vector<8x128xf32>
    %104 = arith.addf %100, %103 : vector<8x128xf32>
    %105 = math.tanh %104 : vector<8x128xf32>
    %cst_52 = arith.constant dense<0.000000e+00> : vector<8x128xf32>
    %106 = tpu.matmul %105, %5, %cst_52 {dimension_numbers = #tpu.dot_dimension_numbers<[1], [0], [0], [1], [0, 0, 1, 1], [], []>} : vector<8x128xf32>, vector<128x128xf32>, vector<8x128xf32> -> vector<8x128xf32>
    %107 = vector.broadcast %6 : vector<1x128xf32> to vector<8x128xf32>
    %108 = arith.addf %106, %107 : vector<8x128xf32>
    %109 = arith.index_cast %c4_i32 : i32 to index
    %c0_53 = arith.constant 0 : index
    %c0_54 = arith.constant 0 : index
    %110 = vector.load %arg8[%109, %c0_53, %c0_54] : memref<8x8x128xf32, #tpu.memory_space<vmem>>, vector<1x8x128xf32>
    %111 = vector.shape_cast %110 : vector<1x8x128xf32> to vector<8x128xf32>
    %112 = vector.shape_cast %108 : vector<8x128xf32> to vector<1x8x128xf32>
    tpu.vector_store %arg8[%109, %c0_53, %c0_54], %112 {strides = array<i32>} : memref<8x8x128xf32, #tpu.memory_space<vmem>>, vector<1x8x128xf32>,
    %c5_i32 = arith.constant 5 : i32
    %cst_55 = arith.constant dense<0.000000e+00> : vector<8x256xf32>
    %113 = tpu.matmul %105, %3, %cst_55 {dimension_numbers = #tpu.dot_dimension_numbers<[1], [0], [0], [1], [0, 0, 1, 1], [], []>} : vector<8x128xf32>, vector<128x256xf32>, vector<8x256xf32> -> vector<8x256xf32>
    %114 = vector.extract_strided_slice %113 {offsets = [0, 128], sizes = [8, 128], strides = [1, 1]} : vector<8x256xf32> to vector<8x128xf32>
    %115 = arith.index_cast %c5_i32 : i32 to index
    %c0_56 = arith.constant 0 : index
    %c0_57 = arith.constant 0 : index
    %116 = vector.load %arg2[%115, %c0_56, %c0_57] : memref<8x8x128xf32, #tpu.memory_space<vmem>>, vector<1x8x128xf32>
    %117 = vector.shape_cast %116 : vector<1x8x128xf32> to vector<8x128xf32>
    %118 = arith.mulf %114, %117 : vector<8x128xf32>
    %cst_58 = arith.constant dense<0.000000e+00> : vector<8x128xf32>
    %119 = tpu.matmul %118, %4, %cst_58 {dimension_numbers = #tpu.dot_dimension_numbers<[1], [0], [0], [1], [0, 0, 1, 1], [], []>} : vector<8x128xf32>, vector<128x128xf32>, vector<8x128xf32> -> vector<8x128xf32>
    %120 = vector.extract_strided_slice %113 {offsets = [0, 0], sizes = [8, 128], strides = [1, 1]} : vector<8x256xf32> to vector<8x128xf32>
    %121 = arith.addf %119, %120 : vector<8x128xf32>
    %122 = arith.index_cast %c5_i32 : i32 to index
    %c0_59 = arith.constant 0 : index
    %c0_60 = arith.constant 0 : index
    %123 = vector.load %arg3[%122, %c0_59, %c0_60] : memref<8x8x128xf32, #tpu.memory_space<vmem>>, vector<1x8x128xf32>
    %124 = vector.shape_cast %123 : vector<1x8x128xf32> to vector<8x128xf32>
    %125 = arith.addf %121, %124 : vector<8x128xf32>
    %126 = math.tanh %125 : vector<8x128xf32>
    %cst_61 = arith.constant dense<0.000000e+00> : vector<8x128xf32>
    %127 = tpu.matmul %126, %5, %cst_61 {dimension_numbers = #tpu.dot_dimension_numbers<[1], [0], [0], [1], [0, 0, 1, 1], [], []>} : vector<8x128xf32>, vector<128x128xf32>, vector<8x128xf32> -> vector<8x128xf32>
    %128 = vector.broadcast %6 : vector<1x128xf32> to vector<8x128xf32>
    %129 = arith.addf %127, %128 : vector<8x128xf32>
    %130 = arith.index_cast %c5_i32 : i32 to index
    %c0_62 = arith.constant 0 : index
    %c0_63 = arith.constant 0 : index
    %131 = vector.load %arg8[%130, %c0_62, %c0_63] : memref<8x8x128xf32, #tpu.memory_space<vmem>>, vector<1x8x128xf32>
    %132 = vector.shape_cast %131 : vector<1x8x128xf32> to vector<8x128xf32>
    %133 = vector.shape_cast %129 : vector<8x128xf32> to vector<1x8x128xf32>
    tpu.vector_store %arg8[%130, %c0_62, %c0_63], %133 {strides = array<i32>} : memref<8x8x128xf32, #tpu.memory_space<vmem>>, vector<1x8x128xf32>,
    %c6_i32 = arith.constant 6 : i32
    %cst_64 = arith.constant dense<0.000000e+00> : vector<8x256xf32>
    %134 = tpu.matmul %126, %3, %cst_64 {dimension_numbers = #tpu.dot_dimension_numbers<[1], [0], [0], [1], [0, 0, 1, 1], [], []>} : vector<8x128xf32>, vector<128x256xf32>, vector<8x256xf32> -> vector<8x256xf32>
    %135 = vector.extract_strided_slice %134 {offsets = [0, 128], sizes = [8, 128], strides = [1, 1]} : vector<8x256xf32> to vector<8x128xf32>
    %136 = arith.index_cast %c6_i32 : i32 to index
    %c0_65 = arith.constant 0 : index
    %c0_66 = arith.constant 0 : index
    %137 = vector.load %arg2[%136, %c0_65, %c0_66] : memref<8x8x128xf32, #tpu.memory_space<vmem>>, vector<1x8x128xf32>
    %138 = vector.shape_cast %137 : vector<1x8x128xf32> to vector<8x128xf32>
    %139 = arith.mulf %135, %138 : vector<8x128xf32>
    %cst_67 = arith.constant dense<0.000000e+00> : vector<8x128xf32>
    %140 = tpu.matmul %139, %4, %cst_67 {dimension_numbers = #tpu.dot_dimension_numbers<[1], [0], [0], [1], [0, 0, 1, 1], [], []>} : vector<8x128xf32>, vector<128x128xf32>, vector<8x128xf32> -> vector<8x128xf32>
    %141 = vector.extract_strided_slice %134 {offsets = [0, 0], sizes = [8, 128], strides = [1, 1]} : vector<8x256xf32> to vector<8x128xf32>
    %142 = arith.addf %140, %141 : vector<8x128xf32>
    %143 = arith.index_cast %c6_i32 : i32 to index
    %c0_68 = arith.constant 0 : index
    %c0_69 = arith.constant 0 : index
    %144 = vector.load %arg3[%143, %c0_68, %c0_69] : memref<8x8x128xf32, #tpu.memory_space<vmem>>, vector<1x8x128xf32>
    %145 = vector.shape_cast %144 : vector<1x8x128xf32> to vector<8x128xf32>
    %146 = arith.addf %142, %145 : vector<8x128xf32>
    %147 = math.tanh %146 : vector<8x128xf32>
    %cst_70 = arith.constant dense<0.000000e+00> : vector<8x128xf32>
    %148 = tpu.matmul %147, %5, %cst_70 {dimension_numbers = #tpu.dot_dimension_numbers<[1], [0], [0], [1], [0, 0, 1, 1], [], []>} : vector<8x128xf32>, vector<128x128xf32>, vector<8x128xf32> -> vector<8x128xf32>
    %149 = vector.broadcast %6 : vector<1x128xf32> to vector<8x128xf32>
    %150 = arith.addf %148, %149 : vector<8x128xf32>
    %151 = arith.index_cast %c6_i32 : i32 to index
    %c0_71 = arith.constant 0 : index
    %c0_72 = arith.constant 0 : index
    %152 = vector.load %arg8[%151, %c0_71, %c0_72] : memref<8x8x128xf32, #tpu.memory_space<vmem>>, vector<1x8x128xf32>
    %153 = vector.shape_cast %152 : vector<1x8x128xf32> to vector<8x128xf32>
    %154 = vector.shape_cast %150 : vector<8x128xf32> to vector<1x8x128xf32>
    tpu.vector_store %arg8[%151, %c0_71, %c0_72], %154 {strides = array<i32>} : memref<8x8x128xf32, #tpu.memory_space<vmem>>, vector<1x8x128xf32>,
    %c7_i32 = arith.constant 7 : i32
    %cst_73 = arith.constant dense<0.000000e+00> : vector<8x256xf32>
    %155 = tpu.matmul %147, %3, %cst_73 {dimension_numbers = #tpu.dot_dimension_numbers<[1], [0], [0], [1], [0, 0, 1, 1], [], []>} : vector<8x128xf32>, vector<128x256xf32>, vector<8x256xf32> -> vector<8x256xf32>
    %156 = vector.extract_strided_slice %155 {offsets = [0, 128], sizes = [8, 128], strides = [1, 1]} : vector<8x256xf32> to vector<8x128xf32>
    %157 = arith.index_cast %c7_i32 : i32 to index
    %c0_74 = arith.constant 0 : index
    %c0_75 = arith.constant 0 : index
    %158 = vector.load %arg2[%157, %c0_74, %c0_75] : memref<8x8x128xf32, #tpu.memory_space<vmem>>, vector<1x8x128xf32>
    %159 = vector.shape_cast %158 : vector<1x8x128xf32> to vector<8x128xf32>
    %160 = arith.mulf %156, %159 : vector<8x128xf32>
    %cst_76 = arith.constant dense<0.000000e+00> : vector<8x128xf32>
    %161 = tpu.matmul %160, %4, %cst_76 {dimension_numbers = #tpu.dot_dimension_numbers<[1], [0], [0], [1], [0, 0, 1, 1], [], []>} : vector<8x128xf32>, vector<128x128xf32>, vector<8x128xf32> -> vector<8x128xf32>
    %162 = vector.extract_strided_slice %155 {offsets = [0, 0], sizes = [8, 128], strides = [1, 1]} : vector<8x256xf32> to vector<8x128xf32>
    %163 = arith.addf %161, %162 : vector<8x128xf32>
    %164 = arith.index_cast %c7_i32 : i32 to index
    %c0_77 = arith.constant 0 : index
    %c0_78 = arith.constant 0 : index
    %165 = vector.load %arg3[%164, %c0_77, %c0_78] : memref<8x8x128xf32, #tpu.memory_space<vmem>>, vector<1x8x128xf32>
    %166 = vector.shape_cast %165 : vector<1x8x128xf32> to vector<8x128xf32>
    %167 = arith.addf %163, %166 : vector<8x128xf32>
    %168 = math.tanh %167 : vector<8x128xf32>
    %cst_79 = arith.constant dense<0.000000e+00> : vector<8x128xf32>
    %169 = tpu.matmul %168, %5, %cst_79 {dimension_numbers = #tpu.dot_dimension_numbers<[1], [0], [0], [1], [0, 0, 1, 1], [], []>} : vector<8x128xf32>, vector<128x128xf32>, vector<8x128xf32> -> vector<8x128xf32>
    %170 = vector.broadcast %6 : vector<1x128xf32> to vector<8x128xf32>
    %171 = arith.addf %169, %170 : vector<8x128xf32>
    %172 = arith.index_cast %c7_i32 : i32 to index
    %c0_80 = arith.constant 0 : index
    %c0_81 = arith.constant 0 : index
    %173 = vector.load %arg8[%172, %c0_80, %c0_81] : memref<8x8x128xf32, #tpu.memory_space<vmem>>, vector<1x8x128xf32>
    %174 = vector.shape_cast %173 : vector<1x8x128xf32> to vector<8x128xf32>
    %175 = vector.shape_cast %171 : vector<8x128xf32> to vector<1x8x128xf32>
    tpu.vector_store %arg8[%172, %c0_80, %c0_81], %175 {strides = array<i32>} : memref<8x8x128xf32, #tpu.memory_space<vmem>>, vector<1x8x128xf32>,
    %c8_i32 = arith.constant 8 : i32
    %c0_82 = arith.constant 0 : index
    %c0_83 = arith.constant 0 : index
    %176 = vector.load %arg9[%c0_82, %c0_83] : memref<8x128xf32, #tpu.memory_space<vmem>>, vector<8x128xf32>
    tpu.vector_store %arg9[%c0_82, %c0_83], %168 {strides = array<i32>} : memref<8x128xf32, #tpu.memory_space<vmem>>, vector<8x128xf32>,
    return
  }
  func.func @transform_0(%arg0: i32, %arg1: i32) -> (i32, i32, i32) {
    %c0_i32 = arith.constant 0 : i32
    %c0_i32_0 = arith.constant 0 : i32
    return %arg1, %arg0, %c0_i32 : i32, i32, i32
  }
  func.func @transform_1(%arg0: i32, %arg1: i32) -> (i32, i32, i32) {
    %c0_i32 = arith.constant 0 : i32
    %c0_i32_0 = arith.constant 0 : i32
    return %arg1, %arg0, %c0_i32 : i32, i32, i32
  }
  func.func @transform_2(%arg0: i32, %arg1: i32) -> (i32, i32) {
    %c0_i32 = arith.constant 0 : i32
    %c0_i32_0 = arith.constant 0 : i32
    %c0_i32_1 = arith.constant 0 : i32
    return %c0_i32, %c0_i32_0 : i32, i32
  }
  func.func @transform_3(%arg0: i32, %arg1: i32) -> (i32, i32) {
    %c0_i32 = arith.constant 0 : i32
    %c0_i32_0 = arith.constant 0 : i32
    %c0_i32_1 = arith.constant 0 : i32
    return %c0_i32, %c0_i32_0 : i32, i32
  }
  func.func @transform_4(%arg0: i32, %arg1: i32) -> (i32, i32) {
    %c0_i32 = arith.constant 0 : i32
    %c0_i32_0 = arith.constant 0 : i32
    %c0_i32_1 = arith.constant 0 : i32
    return %c0_i32, %c0_i32_0 : i32, i32
  }
  func.func @transform_5(%arg0: i32, %arg1: i32) -> (i32, i32) {
    %c0_i32 = arith.constant 0 : i32
    %c0_i32_0 = arith.constant 0 : i32
    %c0_i32_1 = arith.constant 0 : i32
    return %c0_i32, %c0_i32_0 : i32, i32
  }
  func.func @transform_6(%arg0: i32, %arg1: i32) -> (i32, i32, i32) {
    %c0_i32 = arith.constant 0 : i32
    %c0_i32_0 = arith.constant 0 : i32
    return %arg1, %arg0, %c0_i32 : i32, i32, i32
  }
}

</mosaic_0001>

<bundles_post_ra>
// kernel: cprnn_forward.1
= control target key start
LH: loop header
LB: loop body
LE: loop exit
PB: predicated region body
PF: predicated region fallthrough
CT: control target
= control target key end

     0   :  { %v3375_v3 = vmov 0.0   ;;  %v3376_v4 = vmov 0.0|0.0   ;;  %vm3377_vm0 = vmmov 0   ;;  %s4179_s2 = inlined_call_operand.vmem [shape: f32[128,256], index: 2, kind: input, shape index: {}]   ;;  %s4180_s3 = inlined_call_operand.vmem [shape: f32[128,128], index: 3, kind: input, shape index: {}]   ;;  %s4181_s4 = inlined_call_operand.vmem [shape: f32[128,128], index: 4, kind: input, shape index: {}]   ;;  %s4182_s0 = inlined_call_operand.vmem [shape: f32[8,8,128], index: 0, kind: input, shape index: {}]   ;;  %s4183_s1 = inlined_call_operand.vmem [shape: f32[8,8,128], index: 1, kind: input, shape index: {}]   ;;  %s4184_s5 = inlined_call_operand.vmem [shape: f32[1,128], index: 5, kind: input, shape index: {}]   ;;  %s4185_s6 = inlined_call_operand.vmem [shape: f32[8,8,128], index: 6, kind: output, shape index: {}]  }
   0x1   :  { %v29_v0 = vld [vmem:[%s4179_s2 + $0x8] sm:$0xff]  ;;  %v31_v1 = vld [vmem:[%s4179_s2 + $0x18] sm:$0xff]  ;;  %v28_v2 = vld [vmem:[%s4179_s2] sm:$0xff]  ;;  %158 = vmatprep.mubr.f32.mxu0 %v3375_v3  ;;  %2748 = vmatprep.subr.bf16.mxu1 %v3376_v4 }
   0x2   :  { %v3424_v5 = vpack.c.bf16 %v31_v1, %v29_v0  ;;  %v30_v6 = vld [vmem:[%s4179_s2 + $0x10] sm:$0xff]  ;;  %v33_v7 = vld [vmem:[%s4179_s2 + $0x28] sm:$0xff]  ;;  %v35_v8 = vld [vmem:[%s4179_s2 + $0x38] sm:$0xff]  ;;  %2188 = vmatprep.mubr.msk.f32.mxu1 %vm3377_vm0, %v3375_v3 }
   0x3   :  { %v3435_v9 = vpack.c.bf16 %v30_v6, %v28_v2  ;;  %v3437_v10 = vpack.c.bf16 %v35_v8, %v33_v7  ;;  %v32_v11 = vld [vmem:[%s4179_s2 + $0x20] sm:$0xff]  ;;  %v34_v12 = vld [vmem:[%s4179_s2 + $0x30] sm:$0xff]  ;;  %v37_v13 = vld [vmem:[%s4179_s2 + $0x48] sm:$0xff] }
   0x4   :  { %2717 = vmatprep.subr.bf16.mxu0 %v3424_v5  ;;  %v39_v14 = vld [vmem:[%s4179_s2 + $0x58] sm:$0xff]  ;;  %v3453_v15 = vpack.c.bf16 %v34_v12, %v32_v11  ;;  %v36_v17 = vld [vmem:[%s4179_s2 + $0x40] sm:$0xff]  ;;  %v38_v18 = vld [vmem:[%s4179_s2 + $0x50] sm:$0xff] }
   0x5   :  { %2719 = vmatpush1.bf16.msra.mxu0 %v3435_v9  ;;  %v3456_v16 = vpack.c.bf16 %v39_v14, %v37_v13  ;;  %v41_v19 = vld [vmem:[%s4179_s2 + $0x68] sm:$0xff]  ;;  %v43_v20 = vld [vmem:[%s4179_s2 + $0x78] sm:$0xff]  ;;  %v3471_v21 = vpack.c.bf16 %v38_v18, %v36_v17  ;;  %v40_v23 = vld [vmem:[%s4179_s2 + $0x60] sm:$0xff] }
   0x6   :  { %2721 = vmatprep.subr.bf16.mxu0 %v3437_v10  ;;  %v3474_v22 = vpack.c.bf16 %v43_v20, %v41_v19  ;;  %v42_v24 = vld [vmem:[%s4179_s2 + $0x70] sm:$0xff]  ;;  %v45_v25 = vld [vmem:[%s4179_s2 + $0x88] sm:$0xff]  ;;  %v47_v26 = vld [vmem:[%s4179_s2 + $0x98] sm:$0xff] }
   0x7   :  { %v60_v27 = vld [vmem:[%s4180_s3] sm:$0xff]  ;;  %v61_v28 = vld [vmem:[%s4180_s3 + $0x8] sm:$0xff]  ;;  %v62_v29 = vld [vmem:[%s4180_s3 + $0x10] sm:$0xff]  ;;  %v3501_v31 = vpack.c.bf16 %v42_v24, %v40_v23  ;;  %v3506_v33 = vpack.c.bf16 %v47_v26, %v45_v25 }
   0x8   :  { %v63_v30 = vld [vmem:[%s4180_s3 + $0x18] sm:$0xff]  ;;  %v3503_v32 = vpack.c.bf16 %v61_v28, %v60_v27  ;;  %v44_v34 = vld [vmem:[%s4179_s2 + $0x80] sm:$0xff]  ;;  %v46_v35 = vld [vmem:[%s4179_s2 + $0x90] sm:$0xff] }
   0x9   :  { %2723 = vmatpush1.bf16.msra.mxu0 %v3453_v15  ;;  %v49_v36 = vld [vmem:[%s4179_s2 + $0xa8] sm:$0xff]  ;;  %v51_v37 = vld [vmem:[%s4179_s2 + $0xb8] sm:$0xff]  ;;  %v3521_v38 = vpack.c.bf16 %v63_v30, %v62_v29  ;;  %v64_v39 = vld [vmem:[%s4180_s3 + $0x20] sm:$0xff]  ;;  %v3531_v41 = vpack.c.bf16 %v46_v35, %v44_v34 }
   0xa   :  { %2725 = vmatprep.subr.bf16.mxu0 %v3456_v16  ;;  %2750 = vmatpush3.bf16.msra.mxu1 %v3503_v32  ;;  %v65_v40 = vld [vmem:[%s4180_s3 + $0x28] sm:$0xff]  ;;  %v3534_v42 = vpack.c.bf16 %v51_v37, %v49_v36  ;;  %v48_v43 = vld [vmem:[%s4179_s2 + $0xa0] sm:$0xff]  ;;  %v50_v44 = vld [vmem:[%s4179_s2 + $0xb0] sm:$0xff] }
   0xb   :  { %2751 = vmatprep.subr.bf16.mxu1 %v3376_v4  ;;  %v53_v45 = vld [vmem:[%s4179_s2 + $0xc8] sm:$0xff]  ;;  %v55_v46 = vld [vmem:[%s4179_s2 + $0xd8] sm:$0xff]  ;;  %v3549_v47 = vpack.c.bf16 %v65_v40, %v64_v39  ;;  %v66_v48 = vld [vmem:[%s4180_s3 + $0x30] sm:$0xff]  ;;  %v3559_v50 = vpack.c.bf16 %v50_v44, %v48_v43 }
   0xc   :  { %v67_v49 = vld [vmem:[%s4180_s3 + $0x38] sm:$0xff]  ;;  %v3562_v51 = vpack.c.bf16 %v55_v46, %v53_v45  ;;  %v52_v52 = vld [vmem:[%s4179_s2 + $0xc0] sm:$0xff]  ;;  %v54_v53 = vld [vmem:[%s4179_s2 + $0xd0] sm:$0xff] }
   0xd   :  { %2727 = vmatpush1.bf16.msra.mxu0 %v3471_v21  ;;  %v57_v54 = vld [vmem:[%s4179_s2 + $0xe8] sm:$0xff]  ;;  %v59_v55 = vld [vmem:[%s4179_s2 + $0xf8] sm:$0xff]  ;;  %v3577_v56 = vpack.c.bf16 %v67_v49, %v66_v48  ;;  %v68_v57 = vld [vmem:[%s4180_s3 + $0x40] sm:$0xff]  ;;  %v3587_v59 = vpack.c.bf16 %v54_v53, %v52_v52 }
   0xe   :  { %2729 = vmatprep.subr.bf16.mxu0 %v3474_v22  ;;  %2753 = vmatpush3.bf16.msra.mxu1 %v3521_v38  ;;  %v69_v58 = vld [vmem:[%s4180_s3 + $0x48] sm:$0xff]  ;;  %v3590_v60 = vpack.c.bf16 %v59_v55, %v57_v54  ;;  %v56_v61 = vld [vmem:[%s4179_s2 + $0xe0] sm:$0xff]  ;;  %v58_v62 = vld [vmem:[%s4179_s2 + $0xf0] sm:$0xff] }
   0xf   :  { %2754 = vmatprep.subr.bf16.mxu1 %v3376_v4  ;;  %v3599_v63 = vpack.c.bf16 %v69_v58, %v68_v57  ;;  %v70_v0 = vld [vmem:[%s4180_s3 + $0x50] sm:$0xff]  ;;  %v71_v1 = vld [vmem:[%s4180_s3 + $0x58] sm:$0xff]  ;;  %v3609_v2 = vpack.c.bf16 %v58_v62, %v56_v61  ;;  %v72_v7 = vld [vmem:[%s4180_s3 + $0x60] sm:$0xff] }
  0x10   :  { %v3613_v6 = vpack.c.bf16 %v71_v1, %v70_v0  ;;  %v73_v8 = vld [vmem:[%s4180_s3 + $0x68] sm:$0xff]  ;;  %v74_v12 = vld [vmem:[%s4180_s3 + $0x70] sm:$0xff]  ;;  %v75_v13 = vld [vmem:[%s4180_s3 + $0x78] sm:$0xff] }
  0x11   :  { %2731 = vmatpush1.bf16.msra.mxu0 %v3501_v31  ;;  %v3625_v11 = vpack.c.bf16 %v73_v8, %v72_v7  ;;  %v3637_v14 = vpack.c.bf16 %v75_v13, %v74_v12  ;;  %v76_v17 = vld [vmem:[%s4181_s4] sm:$0xff]  ;;  %v77_v18 = vld [vmem:[%s4181_s4 + $0x8] sm:$0xff]  ;;  %v78_v20 = vld [vmem:[%s4181_s4 + $0x10] sm:$0xff] }
  0x12   :  { %2733 = vmatprep.subr.bf16.mxu0 %v3506_v33  ;;  %2756 = vmatpush3.bf16.msra.mxu1 %v3549_v47  ;;  %v3651_v19 = vpack.c.bf16 %v77_v18, %v76_v17  ;;  %v79_v23 = vld [vmem:[%s4181_s4 + $0x18] sm:$0xff]  ;;  %v80_v25 = vld [vmem:[%s4181_s4 + $0x20] sm:$0xff]  ;;  %v81_v26 = vld [vmem:[%s4181_s4 + $0x28] sm:$0xff] }
  0x13   :  { %2757 = vmatprep.subr.bf16.mxu1 %v3376_v4  ;;  %v3660_v24 = vpack.c.bf16 %v79_v23, %v78_v20  ;;  %v3670_v27 = vpack.c.bf16 %v81_v26, %v80_v25  ;;  %v82_v28 = vld [vmem:[%s4181_s4 + $0x30] sm:$0xff]  ;;  %v83_v29 = vld [vmem:[%s4181_s4 + $0x38] sm:$0xff]  ;;  %v165_v34 = vld [vmem:[%s4182_s0] sm:$0xff] }
  0x14   :  { %v3680_v30 = vpack.c.bf16 %v83_v29, %v82_v28  ;;  %v84_v39 = vld [vmem:[%s4181_s4 + $0x40] sm:$0xff]  ;;  %v85_v40 = vld [vmem:[%s4181_s4 + $0x48] sm:$0xff]  ;;  %v86_v44 = vld [vmem:[%s4181_s4 + $0x50] sm:$0xff] }
  0x15   :  { %2735 = vmatpush1.bf16.msra.mxu0 %v3531_v41  ;;  %v3711_v43 = vpack.c.bf16 %v85_v40, %v84_v39  ;;  %v87_v45 = vld [vmem:[%s4181_s4 + $0x58] sm:$0xff]  ;;  %v88_v48 = vld [vmem:[%s4181_s4 + $0x60] sm:$0xff]  ;;  %v89_v49 = vld [vmem:[%s4181_s4 + $0x68] sm:$0xff] }
  0x16   :  { %2737 = vmatprep.subr.bf16.mxu0 %v3534_v42  ;;  %2759 = vmatpush3.bf16.msra.mxu1 %v3577_v56  ;;  %v3721_v46 = vpack.c.bf16 %v87_v45, %v86_v44  ;;  %v3731_v52 = vpack.c.bf16 %v89_v49, %v88_v48  ;;  %v90_v53 = vld [vmem:[%s4181_s4 + $0x70] sm:$0xff]  ;;  %v91_v54 = vld [vmem:[%s4181_s4 + $0x78] sm:$0xff]  ;;  %v237_v58 = vld [vmem:[%s4183_s1] sm:$0xff] }
  0x17   :  { %2760 = vmatprep.subr.bf16.mxu1 %v3376_v4  ;;  %v3740_v55 = vpack.c.bf16 %v91_v54, %v90_v53  ;;  %v3787_v7 = vld [vmem:[%s4184_s5] ss:$0 sm:$0xff]  ;;  %v1863_v8 = vld [vmem:[%s4182_s0 + $0x8] sm:$0xff]  ;;  %v1867_v53 = vld [vmem:[%s4183_s1 + $0x10] sm:$0xff] }
  0x18   :  { %v1864_v26 = vld [vmem:[%s4183_s1 + $0x8] sm:$0xff] }
  0x19   :  { %2739 = vmatpush1.bf16.msra.mxu0 %v3559_v50 }
  0x1a   :  { %2741 = vmatprep.subr.bf16.mxu0 %v3562_v51  ;;  %2762 = vmatpush3.bf16.msra.mxu1 %v3599_v63 }
  0x1b   :  { %2763 = vmatprep.subr.bf16.mxu1 %v3376_v4 }
  0x1d   :  { %2743 = vmatpush1.bf16.msra.mxu0 %v3587_v59 }
  0x1e   :  { %2745 = vmatprep.subr.bf16.mxu0 %v3590_v60  ;;  %2765 = vmatpush3.bf16.msra.mxu1 %v3613_v6 }
  0x1f   :  { %2766 = vmatprep.subr.bf16.mxu1 %v3376_v4 }
  0x21   :  { %2747 = vmatpush1.bf16.msra.mxu0 %v3609_v2 }
  0x22   :  { %2772 = vmatprep.subr.bf16.mxu0 %v3376_v4  ;;  %2768 = vmatpush3.bf16.msra.mxu1 %v3625_v11 }
  0x23   :  { %2769 = vmatprep.subr.bf16.mxu1 %v3376_v4 }
  0x24   :  { %159 = vmatmul.mubr.f32.vlgmr.msra.gmra.mrb[0].mxu0 %v3375_v3 }
  0x25   :  { %2223 = vmatprep.mubr.msk.f32.mxu0 %vm3377_vm0, %v3375_v3  ;;  %2774 = vmatpush3.bf16.msra.mxu0 %v3651_v19 }
  0x26   :  { %2771 = vmatpush3.bf16.msra.mxu1 %v3637_v14  ;;  %2775 = vmatprep.subr.bf16.mxu0 %v3376_v4 }
  0x27   :  { %2797 = vmatprep.subr.bf16.mxu1 %v3424_v5 }
  0x29   :  { %2777 = vmatpush3.bf16.msra.mxu0 %v3660_v24 }
  0x2a   :  { %2778 = vmatprep.subr.bf16.mxu0 %v3376_v4 }
  0x2d   :  { %2780 = vmatpush3.bf16.msra.mxu0 %v3670_v27 }
  0x2e   :  { %2781 = vmatprep.subr.bf16.mxu0 %v3376_v4 }
  0x31   :  { %2783 = vmatpush3.bf16.msra.mxu0 %v3680_v30 }
  0x32   :  { %2784 = vmatprep.subr.bf16.mxu0 %v3376_v4 }
  0x35   :  { %2786 = vmatpush3.bf16.msra.mxu0 %v3711_v43 }
  0x36   :  { %2787 = vmatprep.subr.bf16.mxu0 %v3376_v4 }
  0x39   :  { %2789 = vmatpush3.bf16.msra.mxu0 %v3721_v46 }
  0x3a   :  { %2790 = vmatprep.subr.bf16.mxu0 %v3376_v4 }
  0x3d   :  { %2792 = vmatpush3.bf16.msra.mxu0 %v3731_v52 }
  0x3e   :  { %2793 = vmatprep.subr.bf16.mxu0 %v3376_v4 }
  0x41   :  { %2795 = vmatpush3.bf16.msra.mxu0 %v3740_v55 }
  0x42   :  { %2828 = vmatprep.subr.bf16.mxu0 %v3376_v4 }
  0xf7   :  { %v160_v35 = vpop.f32.mrb[0].mxu0 }
  0xf8   :  { %v162_v36 = vpop.f32.mrb[1].mxu0 }
  0xf9   :  { %v166_v37 = vmul.f32 %v165_v34, %v162_v36  ;;  %v1866_v36 = vld [vmem:[%s4182_s0 + $0x10] sm:$0xff] }
  0xfb   :  { %2189 = vmatmul.mubr.f32.vlgmr.msra.gmra.mrb[0].mxu1 %v166_v37 }
  0xfc   :  { %2799 = vmatpush1.bf16.msra.mxu1 %v3435_v9  ;;  %381 = vmatprep.mubr.f32.mxu1 %v3375_v3 }
  0xfd   :  { %2801 = vmatprep.subr.bf16.mxu1 %v3437_v10 }
 0x100   :  { %2803 = vmatpush1.bf16.msra.mxu1 %v3453_v15 }
 0x101   :  { %2805 = vmatprep.subr.bf16.mxu1 %v3456_v16 }
 0x104   :  { %2807 = vmatpush1.bf16.msra.mxu1 %v3471_v21 }
 0x105   :  { %2809 = vmatprep.subr.bf16.mxu1 %v3474_v22 }
 0x108   :  { %2811 = vmatpush1.bf16.msra.mxu1 %v3501_v31 }
 0x109   :  { %2813 = vmatprep.subr.bf16.mxu1 %v3506_v33 }
 0x10c   :  { %2815 = vmatpush1.bf16.msra.mxu1 %v3531_v41 }
 0x10d   :  { %2817 = vmatprep.subr.bf16.mxu1 %v3534_v42 }
 0x110   :  { %2819 = vmatpush1.bf16.msra.mxu1 %v3559_v50 }
 0x111   :  { %2821 = vmatprep.subr.bf16.mxu1 %v3562_v51 }
 0x114   :  { %2823 = vmatpush1.bf16.msra.mxu1 %v3587_v59 }
 0x115   :  { %2825 = vmatprep.subr.bf16.mxu1 %v3590_v60 }
 0x118   :  { %2827 = vmatpush1.bf16.msra.mxu1 %v3609_v2 }
 0x119   :  { %2852 = vmatprep.subr.bf16.mxu1 %v3376_v4 }
 0x1ce   :  { %v233_v57 = vpop.f32.mrb[0].mxu1 }
 0x1cf   :  { %v234_v61 = vadd.f32 %v233_v57, %v160_v35  ;;  %v2190_v62 = vpop.f32.mrb[1].mxu1 }
 0x1d0   :  { %v1869_v62 = vld [vmem:[%s4182_s0 + $0x18] sm:$0xff] }
 0x1d1   :  { %v238_v0 = vadd.f32 %v237_v58, %v234_v61 }
 0x1d3   :  { %3359 = vtanh.f32 %v238_v0 }
 0x1dd   :  { %v3360_v1 = vpop.eup %3359 }
 0x1de   :  { %2224 = vmatmul.mubr.f32.vlgmr.msra.gmra.mrb[2].mxu0 %v3360_v1  ;;  %382 = vmatmul.mubr.f32.vlgmr.msra.gmra.mrb[2].mxu1 %v3360_v1 }
 0x1df   :  { %2830 = vmatpush3.bf16.msra.mxu0 %v3503_v32  ;;  %2258 = vmatprep.mubr.msk.f32.mxu0 %vm3377_vm0, %v3375_v3 }
 0x1e0   :  { %2831 = vmatprep.subr.bf16.mxu0 %v3376_v4  ;;  %2854 = vmatpush3.bf16.msra.mxu1 %v3651_v19 }
 0x1e1   :  { %2855 = vmatprep.subr.bf16.mxu1 %v3376_v4  ;;  %2293 = vmatprep.mubr.msk.f32.mxu1 %vm3377_vm0, %v3375_v3 }
 0x1e3   :  { %2833 = vmatpush3.bf16.msra.mxu0 %v3521_v38 }
 0x1e4   :  { %2834 = vmatprep.subr.bf16.mxu0 %v3376_v4  ;;  %2857 = vmatpush3.bf16.msra.mxu1 %v3660_v24 }
 0x1e5   :  { %2858 = vmatprep.subr.bf16.mxu1 %v3376_v4 }
 0x1e7   :  { %2836 = vmatpush3.bf16.msra.mxu0 %v3549_v47 }
 0x1e8   :  { %2837 = vmatprep.subr.bf16.mxu0 %v3376_v4  ;;  %2860 = vmatpush3.bf16.msra.mxu1 %v3670_v27 }
 0x1e9   :  { %2861 = vmatprep.subr.bf16.mxu1 %v3376_v4 }
 0x1eb   :  { %2839 = vmatpush3.bf16.msra.mxu0 %v3577_v56 }
 0x1ec   :  { %2840 = vmatprep.subr.bf16.mxu0 %v3376_v4  ;;  %2863 = vmatpush3.bf16.msra.mxu1 %v3680_v30 }
 0x1ed   :  { %2864 = vmatprep.subr.bf16.mxu1 %v3376_v4 }
 0x1ef   :  { %2842 = vmatpush3.bf16.msra.mxu0 %v3599_v63 }
 0x1f0   :  { %2843 = vmatprep.subr.bf16.mxu0 %v3376_v4  ;;  %2866 = vmatpush3.bf16.msra.mxu1 %v3711_v43 }
 0x1f1   :  { %2867 = vmatprep.subr.bf16.mxu1 %v3376_v4 }
 0x1f3   :  { %2845 = vmatpush3.bf16.msra.mxu0 %v3613_v6 }
 0x1f4   :  { %2846 = vmatprep.subr.bf16.mxu0 %v3376_v4  ;;  %2869 = vmatpush3.bf16.msra.mxu1 %v3721_v46 }
 0x1f5   :  { %2870 = vmatprep.subr.bf16.mxu1 %v3376_v4 }
 0x1f7   :  { %2848 = vmatpush3.bf16.msra.mxu0 %v3625_v11 }
 0x1f8   :  { %2849 = vmatprep.subr.bf16.mxu0 %v3376_v4  ;;  %2872 = vmatpush3.bf16.msra.mxu1 %v3731_v52 }
 0x1f9   :  { %2873 = vmatprep.subr.bf16.mxu1 %v3376_v4 }
 0x1fb   :  { %2851 = vmatpush3.bf16.msra.mxu0 %v3637_v14 }
 0x1fc   :  { %2877 = vmatprep.subr.bf16.mxu0 %v3424_v5  ;;  %2875 = vmatpush3.bf16.msra.mxu1 %v3740_v55 }
 0x1fd   :  { %2908 = vmatprep.subr.bf16.mxu1 %v3376_v4 }
 0x2b1   :  { %v312_v12 = vpop.f32.mrb[2].mxu0  ;;  %v383_v13 = vpop.f32.mrb[2].mxu1 }
 0x2b2   :  { %v313_v17 = vadd.f32 %v3787_v7, %v312_v12  ;;  %v2225_v18 = vpop.f32.mrb[3].mxu0  ;;  %v385_v20 = vpop.f32.mrb[3].mxu1 }
 0x2b3   :  { %v390_v23 = vmul.f32 %v1863_v8, %v385_v20  ;;  %v1870_v20 = vld [vmem:[%s4183_s1 + $0x18] sm:$0xff] }
 0x2b4   :  { %316 = vst [vmem:[%s4185_s6] sm:$0xff] %v313_v17 }
 0x2b5   :  { %2259 = vmatmul.mubr.f32.vlgmr.msra.gmra.mrb[4].mxu0 %v390_v23 }
 0x2b6   :  { %2879 = vmatpush1.bf16.msra.mxu0 %v3435_v9  ;;  %601 = vmatprep.mubr.f32.mxu0 %v3375_v3 }
 0x2b7   :  { %2881 = vmatprep.subr.bf16.mxu0 %v3437_v10 }
 0x2ba   :  { %2883 = vmatpush1.bf16.msra.mxu0 %v3453_v15 }
 0x2bb   :  { %2885 = vmatprep.subr.bf16.mxu0 %v3456_v16 }
 0x2be   :  { %2887 = vmatpush1.bf16.msra.mxu0 %v3471_v21 }
 0x2bf   :  { %2889 = vmatprep.subr.bf16.mxu0 %v3474_v22 }
 0x2c2   :  { %2891 = vmatpush1.bf16.msra.mxu0 %v3501_v31 }
 0x2c3   :  { %2893 = vmatprep.subr.bf16.mxu0 %v3506_v33 }
 0x2c6   :  { %2895 = vmatpush1.bf16.msra.mxu0 %v3531_v41 }
 0x2c7   :  { %2897 = vmatprep.subr.bf16.mxu0 %v3534_v42 }
 0x2ca   :  { %2899 = vmatpush1.bf16.msra.mxu0 %v3559_v50 }
 0x2cb   :  { %2901 = vmatprep.subr.bf16.mxu0 %v3562_v51 }
 0x2ce   :  { %2903 = vmatpush1.bf16.msra.mxu0 %v3587_v59 }
 0x2cf   :  { %2905 = vmatprep.subr.bf16.mxu0 %v3590_v60 }
 0x2d2   :  { %2907 = vmatpush1.bf16.msra.mxu0 %v3609_v2 }
 0x2d3   :  { %2932 = vmatprep.subr.bf16.mxu0 %v3376_v4 }
 0x388   :  { %v457_v25 = vpop.f32.mrb[4].mxu0 }
 0x389   :  { %v458_v28 = vadd.f32 %v457_v25, %v383_v13  ;;  %v2260_v29 = vpop.f32.mrb[5].mxu0 }
 0x38a   :  { %v1872_v29 = vld [vmem:[%s4182_s0 + $0x20] sm:$0xff] }
 0x38b   :  { %v463_v34 = vadd.f32 %v1864_v26, %v458_v28 }
 0x38d   :  { %3361 = vtanh.f32 %v463_v34 }
 0x397   :  { %v3362_v35 = vpop.eup %3361 }
 0x398   :  { %2294 = vmatmul.mubr.f32.vlgmr.msra.gmra.mrb[4].mxu1 %v3362_v35  ;;  %602 = vmatmul.mubr.f32.vlgmr.msra.gmra.mrb[6].mxu0 %v3362_v35 }
 0x399   :  { %2910 = vmatpush3.bf16.msra.mxu1 %v3503_v32  ;;  %2328 = vmatprep.mubr.msk.f32.mxu1 %vm3377_vm0, %v3375_v3 }
 0x39a   :  { %2911 = vmatprep.subr.bf16.mxu1 %v3376_v4  ;;  %2934 = vmatpush3.bf16.msra.mxu0 %v3651_v19 }
 0x39b   :  { %2935 = vmatprep.subr.bf16.mxu0 %v3376_v4  ;;  %2363 = vmatprep.mubr.msk.f32.mxu0 %vm3377_vm0, %v3375_v3 }
 0x39d   :  { %2913 = vmatpush3.bf16.msra.mxu1 %v3521_v38 }
 0x39e   :  { %2914 = vmatprep.subr.bf16.mxu1 %v3376_v4  ;;  %2937 = vmatpush3.bf16.msra.mxu0 %v3660_v24 }
 0x39f   :  { %2938 = vmatprep.subr.bf16.mxu0 %v3376_v4 }
 0x3a1   :  { %2916 = vmatpush3.bf16.msra.mxu1 %v3549_v47 }
 0x3a2   :  { %2917 = vmatprep.subr.bf16.mxu1 %v3376_v4  ;;  %2940 = vmatpush3.bf16.msra.mxu0 %v3670_v27 }
 0x3a3   :  { %2941 = vmatprep.subr.bf16.mxu0 %v3376_v4 }
 0x3a5   :  { %2919 = vmatpush3.bf16.msra.mxu1 %v3577_v56 }
 0x3a6   :  { %2920 = vmatprep.subr.bf16.mxu1 %v3376_v4  ;;  %2943 = vmatpush3.bf16.msra.mxu0 %v3680_v30 }
 0x3a7   :  { %2944 = vmatprep.subr.bf16.mxu0 %v3376_v4 }
 0x3a9   :  { %2922 = vmatpush3.bf16.msra.mxu1 %v3599_v63 }
 0x3aa   :  { %2923 = vmatprep.subr.bf16.mxu1 %v3376_v4  ;;  %2946 = vmatpush3.bf16.msra.mxu0 %v3711_v43 }
 0x3ab   :  { %2947 = vmatprep.subr.bf16.mxu0 %v3376_v4 }
 0x3ad   :  { %2925 = vmatpush3.bf16.msra.mxu1 %v3613_v6 }
 0x3ae   :  { %2926 = vmatprep.subr.bf16.mxu1 %v3376_v4  ;;  %2949 = vmatpush3.bf16.msra.mxu0 %v3721_v46 }
 0x3af   :  { %2950 = vmatprep.subr.bf16.mxu0 %v3376_v4 }
 0x3b1   :  { %2928 = vmatpush3.bf16.msra.mxu1 %v3625_v11 }
 0x3b2   :  { %2929 = vmatprep.subr.bf16.mxu1 %v3376_v4  ;;  %2952 = vmatpush3.bf16.msra.mxu0 %v3731_v52 }
 0x3b3   :  { %2953 = vmatprep.subr.bf16.mxu0 %v3376_v4 }
 0x3b5   :  { %2931 = vmatpush3.bf16.msra.mxu1 %v3637_v14 }
 0x3b6   :  { %2957 = vmatprep.subr.bf16.mxu1 %v3424_v5  ;;  %2955 = vmatpush3.bf16.msra.mxu0 %v3740_v55 }
 0x3b7   :  { %2988 = vmatprep.subr.bf16.mxu0 %v3376_v4 }
 0x46b   :  { %v531_v37 = vpop.f32.mrb[4].mxu1  ;;  %v603_v39 = vpop.f32.mrb[6].mxu0 }
 0x46c   :  { %v532_v40 = vadd.f32 %v3787_v7, %v531_v37  ;;  %v2295_v44 = vpop.f32.mrb[5].mxu1  ;;  %v605_v45 = vpop.f32.mrb[7].mxu0 }
 0x46d   :  { %v610_v48 = vmul.f32 %v1866_v36, %v605_v45  ;;  %v1873_v45 = vld [vmem:[%s4183_s1 + $0x20] sm:$0xff] }
 0x46e   :  { %1865 = vst [vmem:[%s4185_s6 + $0x8] sm:$0xff] %v532_v40 }
 0x46f   :  { %2329 = vmatmul.mubr.f32.vlgmr.msra.gmra.mrb[6].mxu1 %v610_v48 }
 0x470   :  { %2959 = vmatpush1.bf16.msra.mxu1 %v3435_v9  ;;  %821 = vmatprep.mubr.f32.mxu1 %v3375_v3 }
 0x471   :  { %2961 = vmatprep.subr.bf16.mxu1 %v3437_v10 }
 0x474   :  { %2963 = vmatpush1.bf16.msra.mxu1 %v3453_v15 }
 0x475   :  { %2965 = vmatprep.subr.bf16.mxu1 %v3456_v16 }
 0x478   :  { %2967 = vmatpush1.bf16.msra.mxu1 %v3471_v21 }
 0x479   :  { %2969 = vmatprep.subr.bf16.mxu1 %v3474_v22 }
 0x47c   :  { %2971 = vmatpush1.bf16.msra.mxu1 %v3501_v31 }
 0x47d   :  { %2973 = vmatprep.subr.bf16.mxu1 %v3506_v33 }
 0x480   :  { %2975 = vmatpush1.bf16.msra.mxu1 %v3531_v41 }
 0x481   :  { %2977 = vmatprep.subr.bf16.mxu1 %v3534_v42 }
 0x484   :  { %2979 = vmatpush1.bf16.msra.mxu1 %v3559_v50 }
 0x485   :  { %2981 = vmatprep.subr.bf16.mxu1 %v3562_v51 }
 0x488   :  { %2983 = vmatpush1.bf16.msra.mxu1 %v3587_v59 }
 0x489   :  { %2985 = vmatprep.subr.bf16.mxu1 %v3590_v60 }
 0x48c   :  { %2987 = vmatpush1.bf16.msra.mxu1 %v3609_v2 }
 0x48d   :  { %3012 = vmatprep.subr.bf16.mxu1 %v3376_v4 }
 0x542   :  { %v677_v49 = vpop.f32.mrb[6].mxu1 }
 0x543   :  { %v678_v54 = vadd.f32 %v677_v49, %v603_v39  ;;  %v2330_v57 = vpop.f32.mrb[7].mxu1 }
 0x544   :  { %v1875_v57 = vld [vmem:[%s4182_s0 + $0x28] sm:$0xff] }
 0x545   :  { %v683_v58 = vadd.f32 %v1867_v53, %v678_v54 }
 0x547   :  { %3363 = vtanh.f32 %v683_v58 }
 0x551   :  { %v3364_v61 = vpop.eup %3363 }
 0x552   :  { %2364 = vmatmul.mubr.f32.vlgmr.msra.gmra.mrb[8].mxu0 %v3364_v61  ;;  %822 = vmatmul.mubr.f32.vlgmr.msra.gmra.mrb[8].mxu1 %v3364_v61 }
 0x553   :  { %2990 = vmatpush3.bf16.msra.mxu0 %v3503_v32  ;;  %2398 = vmatprep.mubr.msk.f32.mxu0 %vm3377_vm0, %v3375_v3 }
 0x554   :  { %2991 = vmatprep.subr.bf16.mxu0 %v3376_v4  ;;  %3014 = vmatpush3.bf16.msra.mxu1 %v3651_v19 }
 0x555   :  { %3015 = vmatprep.subr.bf16.mxu1 %v3376_v4  ;;  %2433 = vmatprep.mubr.msk.f32.mxu1 %vm3377_vm0, %v3375_v3 }
 0x557   :  { %2993 = vmatpush3.bf16.msra.mxu0 %v3521_v38 }
 0x558   :  { %2994 = vmatprep.subr.bf16.mxu0 %v3376_v4  ;;  %3017 = vmatpush3.bf16.msra.mxu1 %v3660_v24 }
 0x559   :  { %3018 = vmatprep.subr.bf16.mxu1 %v3376_v4 }
 0x55b   :  { %2996 = vmatpush3.bf16.msra.mxu0 %v3549_v47 }
 0x55c   :  { %2997 = vmatprep.subr.bf16.mxu0 %v3376_v4  ;;  %3020 = vmatpush3.bf16.msra.mxu1 %v3670_v27 }
 0x55d   :  { %3021 = vmatprep.subr.bf16.mxu1 %v3376_v4 }
 0x55f   :  { %2999 = vmatpush3.bf16.msra.mxu0 %v3577_v56 }
 0x560   :  { %3000 = vmatprep.subr.bf16.mxu0 %v3376_v4  ;;  %3023 = vmatpush3.bf16.msra.mxu1 %v3680_v30 }
 0x561   :  { %3024 = vmatprep.subr.bf16.mxu1 %v3376_v4 }
 0x563   :  { %3002 = vmatpush3.bf16.msra.mxu0 %v3599_v63 }
 0x564   :  { %3003 = vmatprep.subr.bf16.mxu0 %v3376_v4  ;;  %3026 = vmatpush3.bf16.msra.mxu1 %v3711_v43 }
 0x565   :  { %3027 = vmatprep.subr.bf16.mxu1 %v3376_v4 }
 0x567   :  { %3005 = vmatpush3.bf16.msra.mxu0 %v3613_v6 }
 0x568   :  { %3006 = vmatprep.subr.bf16.mxu0 %v3376_v4  ;;  %3029 = vmatpush3.bf16.msra.mxu1 %v3721_v46 }
 0x569   :  { %3030 = vmatprep.subr.bf16.mxu1 %v3376_v4 }
 0x56b   :  { %3008 = vmatpush3.bf16.msra.mxu0 %v3625_v11 }
 0x56c   :  { %3009 = vmatprep.subr.bf16.mxu0 %v3376_v4  ;;  %3032 = vmatpush3.bf16.msra.mxu1 %v3731_v52 }
 0x56d   :  { %3033 = vmatprep.subr.bf16.mxu1 %v3376_v4 }
 0x56f   :  { %3011 = vmatpush3.bf16.msra.mxu0 %v3637_v14 }
 0x570   :  { %3037 = vmatprep.subr.bf16.mxu0 %v3424_v5  ;;  %3035 = vmatpush3.bf16.msra.mxu1 %v3740_v55 }
 0x571   :  { %3068 = vmatprep.subr.bf16.mxu1 %v3376_v4 }
 0x625   :  { %v751_v0 = vpop.f32.mrb[8].mxu0  ;;  %v823_v1 = vpop.f32.mrb[8].mxu1 }
 0x626   :  { %v752_v8 = vadd.f32 %v3787_v7, %v751_v0  ;;  %v2365_v12 = vpop.f32.mrb[9].mxu0  ;;  %v825_v13 = vpop.f32.mrb[9].mxu1 }
 0x627   :  { %v830_v17 = vmul.f32 %v1869_v62, %v825_v13  ;;  %v1876_v13 = vld [vmem:[%s4183_s1 + $0x28] sm:$0xff] }
 0x628   :  { %1868 = vst [vmem:[%s4185_s6 + $0x10] sm:$0xff] %v752_v8 }
 0x629   :  { %2399 = vmatmul.mubr.f32.vlgmr.msra.gmra.mrb[10].mxu0 %v830_v17 }
 0x62a   :  { %3039 = vmatpush1.bf16.msra.mxu0 %v3435_v9  ;;  %1041 = vmatprep.mubr.f32.mxu0 %v3375_v3 }
 0x62b   :  { %3041 = vmatprep.subr.bf16.mxu0 %v3437_v10 }
 0x62e   :  { %3043 = vmatpush1.bf16.msra.mxu0 %v3453_v15 }
 0x62f   :  { %3045 = vmatprep.subr.bf16.mxu0 %v3456_v16 }
 0x632   :  { %3047 = vmatpush1.bf16.msra.mxu0 %v3471_v21 }
 0x633   :  { %3049 = vmatprep.subr.bf16.mxu0 %v3474_v22 }
 0x636   :  { %3051 = vmatpush1.bf16.msra.mxu0 %v3501_v31 }
 0x637   :  { %3053 = vmatprep.subr.bf16.mxu0 %v3506_v33 }
 0x63a   :  { %3055 = vmatpush1.bf16.msra.mxu0 %v3531_v41 }
 0x63b   :  { %3057 = vmatprep.subr.bf16.mxu0 %v3534_v42 }
 0x63e   :  { %3059 = vmatpush1.bf16.msra.mxu0 %v3559_v50 }
 0x63f   :  { %3061 = vmatprep.subr.bf16.mxu0 %v3562_v51 }
 0x642   :  { %3063 = vmatpush1.bf16.msra.mxu0 %v3587_v59 }
 0x643   :  { %3065 = vmatprep.subr.bf16.mxu0 %v3590_v60 }
 0x646   :  { %3067 = vmatpush1.bf16.msra.mxu0 %v3609_v2 }
 0x647   :  { %3092 = vmatprep.subr.bf16.mxu0 %v3376_v4 }
 0x6fc   :  { %v897_v18 = vpop.f32.mrb[10].mxu0 }
 0x6fd   :  { %v898_v23 = vadd.f32 %v897_v18, %v823_v1  ;;  %v2400_v25 = vpop.f32.mrb[11].mxu0 }
 0x6fe   :  { %v1878_v25 = vld [vmem:[%s4182_s0 + $0x30] sm:$0xff] }
 0x6ff   :  { %v903_v26 = vadd.f32 %v1870_v20, %v898_v23 }
 0x701   :  { %3365 = vtanh.f32 %v903_v26 }
 0x70b   :  { %v3366_v28 = vpop.eup %3365 }
 0x70c   :  { %2434 = vmatmul.mubr.f32.vlgmr.msra.gmra.mrb[10].mxu1 %v3366_v28  ;;  %1042 = vmatmul.mubr.f32.vlgmr.msra.gmra.mrb[12].mxu0 %v3366_v28 }
 0x70d   :  { %3070 = vmatpush3.bf16.msra.mxu1 %v3503_v32  ;;  %2468 = vmatprep.mubr.msk.f32.mxu1 %vm3377_vm0, %v3375_v3 }
 0x70e   :  { %3071 = vmatprep.subr.bf16.mxu1 %v3376_v4  ;;  %3094 = vmatpush3.bf16.msra.mxu0 %v3651_v19 }
 0x70f   :  { %3095 = vmatprep.subr.bf16.mxu0 %v3376_v4  ;;  %2503 = vmatprep.mubr.msk.f32.mxu0 %vm3377_vm0, %v3375_v3 }
 0x711   :  { %3073 = vmatpush3.bf16.msra.mxu1 %v3521_v38 }
 0x712   :  { %3074 = vmatprep.subr.bf16.mxu1 %v3376_v4  ;;  %3097 = vmatpush3.bf16.msra.mxu0 %v3660_v24 }
 0x713   :  { %3098 = vmatprep.subr.bf16.mxu0 %v3376_v4 }
 0x715   :  { %3076 = vmatpush3.bf16.msra.mxu1 %v3549_v47 }
 0x716   :  { %3077 = vmatprep.subr.bf16.mxu1 %v3376_v4  ;;  %3100 = vmatpush3.bf16.msra.mxu0 %v3670_v27 }
 0x717   :  { %3101 = vmatprep.subr.bf16.mxu0 %v3376_v4 }
 0x719   :  { %3079 = vmatpush3.bf16.msra.mxu1 %v3577_v56 }
 0x71a   :  { %3080 = vmatprep.subr.bf16.mxu1 %v3376_v4  ;;  %3103 = vmatpush3.bf16.msra.mxu0 %v3680_v30 }
 0x71b   :  { %3104 = vmatprep.subr.bf16.mxu0 %v3376_v4 }
 0x71d   :  { %3082 = vmatpush3.bf16.msra.mxu1 %v3599_v63 }
 0x71e   :  { %3083 = vmatprep.subr.bf16.mxu1 %v3376_v4  ;;  %3106 = vmatpush3.bf16.msra.mxu0 %v3711_v43 }
 0x71f   :  { %3107 = vmatprep.subr.bf16.mxu0 %v3376_v4 }
 0x721   :  { %3085 = vmatpush3.bf16.msra.mxu1 %v3613_v6 }
 0x722   :  { %3086 = vmatprep.subr.bf16.mxu1 %v3376_v4  ;;  %3109 = vmatpush3.bf16.msra.mxu0 %v3721_v46 }
 0x723   :  { %3110 = vmatprep.subr.bf16.mxu0 %v3376_v4 }
 0x725   :  { %3088 = vmatpush3.bf16.msra.mxu1 %v3625_v11 }
 0x726   :  { %3089 = vmatprep.subr.bf16.mxu1 %v3376_v4  ;;  %3112 = vmatpush3.bf16.msra.mxu0 %v3731_v52 }
 0x727   :  { %3113 = vmatprep.subr.bf16.mxu0 %v3376_v4 }
 0x729   :  { %3091 = vmatpush3.bf16.msra.mxu1 %v3637_v14 }
 0x72a   :  { %3117 = vmatprep.subr.bf16.mxu1 %v3424_v5  ;;  %3115 = vmatpush3.bf16.msra.mxu0 %v3740_v55 }
 0x72b   :  { %3148 = vmatprep.subr.bf16.mxu0 %v3376_v4 }
 0x7df   :  { %v971_v34 = vpop.f32.mrb[10].mxu1  ;;  %v1043_v35 = vpop.f32.mrb[12].mxu0 }
 0x7e0   :  { %v972_v36 = vadd.f32 %v3787_v7, %v971_v34  ;;  %v2435_v37 = vpop.f32.mrb[11].mxu1  ;;  %v1045_v39 = vpop.f32.mrb[13].mxu0 }
 0x7e1   :  { %v1050_v40 = vmul.f32 %v1872_v29, %v1045_v39 }
 0x7e2   :  { %1871 = vst [vmem:[%s4185_s6 + $0x18] sm:$0xff] %v972_v36 }
 0x7e3   :  { %2469 = vmatmul.mubr.f32.vlgmr.msra.gmra.mrb[12].mxu1 %v1050_v40 }
 0x7e4   :  { %3119 = vmatpush1.bf16.msra.mxu1 %v3435_v9  ;;  %1261 = vmatprep.mubr.f32.mxu1 %v3375_v3 }
 0x7e5   :  { %3121 = vmatprep.subr.bf16.mxu1 %v3437_v10 }
 0x7e8   :  { %3123 = vmatpush1.bf16.msra.mxu1 %v3453_v15 }
 0x7e9   :  { %3125 = vmatprep.subr.bf16.mxu1 %v3456_v16 }
 0x7ec   :  { %3127 = vmatpush1.bf16.msra.mxu1 %v3471_v21 }
 0x7ed   :  { %3129 = vmatprep.subr.bf16.mxu1 %v3474_v22 }
 0x7f0   :  { %3131 = vmatpush1.bf16.msra.mxu1 %v3501_v31 }
 0x7f1   :  { %3133 = vmatprep.subr.bf16.mxu1 %v3506_v33 }
 0x7f4   :  { %3135 = vmatpush1.bf16.msra.mxu1 %v3531_v41 }
 0x7f5   :  { %3137 = vmatprep.subr.bf16.mxu1 %v3534_v42 }
 0x7f8   :  { %3139 = vmatpush1.bf16.msra.mxu1 %v3559_v50 }
 0x7f9   :  { %3141 = vmatprep.subr.bf16.mxu1 %v3562_v51 }
 0x7fc   :  { %3143 = vmatpush1.bf16.msra.mxu1 %v3587_v59 }
 0x7fd   :  { %3145 = vmatprep.subr.bf16.mxu1 %v3590_v60 }
 0x800   :  { %3147 = vmatpush1.bf16.msra.mxu1 %v3609_v2 }
 0x801   :  { %3172 = vmatprep.subr.bf16.mxu1 %v3376_v4 }
 0x8b6   :  { %v1117_v44 = vpop.f32.mrb[12].mxu1 }
 0x8b7   :  { %v1118_v48 = vadd.f32 %v1117_v44, %v1043_v35  ;;  %v2470_v49 = vpop.f32.mrb[13].mxu1 }
 0x8b9   :  { %v1123_v53 = vadd.f32 %v1873_v45, %v1118_v48 }
 0x8bb   :  { %3367 = vtanh.f32 %v1123_v53 }
 0x8c5   :  { %v3368_v54 = vpop.eup %3367 }
 0x8c6   :  { %2504 = vmatmul.mubr.f32.vlgmr.msra.gmra.mrb[14].mxu0 %v3368_v54  ;;  %1262 = vmatmul.mubr.f32.vlgmr.msra.gmra.mrb[14].mxu1 %v3368_v54 }
 0x8c7   :  { %3150 = vmatpush3.bf16.msra.mxu0 %v3503_v32  ;;  %2538 = vmatprep.mubr.msk.f32.mxu0 %vm3377_vm0, %v3375_v3 }
 0x8c8   :  { %3151 = vmatprep.subr.bf16.mxu0 %v3376_v4  ;;  %3174 = vmatpush3.bf16.msra.mxu1 %v3651_v19 }
 0x8c9   :  { %3175 = vmatprep.subr.bf16.mxu1 %v3376_v4  ;;  %2573 = vmatprep.mubr.msk.f32.mxu1 %vm3377_vm0, %v3375_v3 }
 0x8cb   :  { %3153 = vmatpush3.bf16.msra.mxu0 %v3521_v38 }
 0x8cc   :  { %3154 = vmatprep.subr.bf16.mxu0 %v3376_v4  ;;  %3177 = vmatpush3.bf16.msra.mxu1 %v3660_v24 }
 0x8cd   :  { %3178 = vmatprep.subr.bf16.mxu1 %v3376_v4 }
 0x8cf   :  { %3156 = vmatpush3.bf16.msra.mxu0 %v3549_v47 }
 0x8d0   :  { %3157 = vmatprep.subr.bf16.mxu0 %v3376_v4  ;;  %3180 = vmatpush3.bf16.msra.mxu1 %v3670_v27 }
 0x8d1   :  { %3181 = vmatprep.subr.bf16.mxu1 %v3376_v4 }
 0x8d3   :  { %3159 = vmatpush3.bf16.msra.mxu0 %v3577_v56 }
 0x8d4   :  { %3160 = vmatprep.subr.bf16.mxu0 %v3376_v4  ;;  %3183 = vmatpush3.bf16.msra.mxu1 %v3680_v30 }
 0x8d5   :  { %3184 = vmatprep.subr.bf16.mxu1 %v3376_v4 }
 0x8d7   :  { %3162 = vmatpush3.bf16.msra.mxu0 %v3599_v63 }
 0x8d8   :  { %3163 = vmatprep.subr.bf16.mxu0 %v3376_v4  ;;  %3186 = vmatpush3.bf16.msra.mxu1 %v3711_v43 }
 0x8d9   :  { %3187 = vmatprep.subr.bf16.mxu1 %v3376_v4 }
 0x8db   :  { %3165 = vmatpush3.bf16.msra.mxu0 %v3613_v6 }
 0x8dc   :  { %3166 = vmatprep.subr.bf16.mxu0 %v3376_v4  ;;  %3189 = vmatpush3.bf16.msra.mxu1 %v3721_v46 }
 0x8dd   :  { %3190 = vmatprep.subr.bf16.mxu1 %v3376_v4 }
 0x8df   :  { %3168 = vmatpush3.bf16.msra.mxu0 %v3625_v11 }
 0x8e0   :  { %3169 = vmatprep.subr.bf16.mxu0 %v3376_v4  ;;  %3192 = vmatpush3.bf16.msra.mxu1 %v3731_v52 }
 0x8e1   :  { %3193 = vmatprep.subr.bf16.mxu1 %v3376_v4 }
 0x8e3   :  { %3171 = vmatpush3.bf16.msra.mxu0 %v3637_v14 }
 0x8e4   :  { %3197 = vmatprep.subr.bf16.mxu0 %v3424_v5  ;;  %3195 = vmatpush3.bf16.msra.mxu1 %v3740_v55 }
 0x8e5   :  { %3228 = vmatprep.subr.bf16.mxu1 %v3376_v4 }
 0x999   :  { %v1191_v58 = vpop.f32.mrb[14].mxu0  ;;  %v1263_v61 = vpop.f32.mrb[14].mxu1 }
 0x99a   :  { %v1192_v62 = vadd.f32 %v3787_v7, %v1191_v58  ;;  %v2505_v0 = vpop.f32.mrb[15].mxu0  ;;  %v1265_v1 = vpop.f32.mrb[15].mxu1 }
 0x99b   :  { %v1270_v8 = vmul.f32 %v1875_v57, %v1265_v1 }
 0x99c   :  { %1874 = vst [vmem:[%s4185_s6 + $0x20] sm:$0xff] %v1192_v62 }
 0x99d   :  { %2539 = vmatmul.mubr.f32.vlgmr.msra.gmra.mrb[16].mxu0 %v1270_v8 }
 0x99e   :  { %3199 = vmatpush1.bf16.msra.mxu0 %v3435_v9  ;;  %1481 = vmatprep.mubr.f32.mxu0 %v3375_v3 }
 0x99f   :  { %3201 = vmatprep.subr.bf16.mxu0 %v3437_v10 }
 0x9a2   :  { %3203 = vmatpush1.bf16.msra.mxu0 %v3453_v15 }
 0x9a3   :  { %3205 = vmatprep.subr.bf16.mxu0 %v3456_v16 }
 0x9a6   :  { %3207 = vmatpush1.bf16.msra.mxu0 %v3471_v21 }
 0x9a7   :  { %3209 = vmatprep.subr.bf16.mxu0 %v3474_v22 }
 0x9aa   :  { %3211 = vmatpush1.bf16.msra.mxu0 %v3501_v31 }
 0x9ab   :  { %3213 = vmatprep.subr.bf16.mxu0 %v3506_v33 }
 0x9ae   :  { %3215 = vmatpush1.bf16.msra.mxu0 %v3531_v41 }
 0x9af   :  { %3217 = vmatprep.subr.bf16.mxu0 %v3534_v42 }
 0x9b2   :  { %3219 = vmatpush1.bf16.msra.mxu0 %v3559_v50 }
 0x9b3   :  { %3221 = vmatprep.subr.bf16.mxu0 %v3562_v51 }
 0x9b6   :  { %3223 = vmatpush1.bf16.msra.mxu0 %v3587_v59 }
 0x9b7   :  { %3225 = vmatprep.subr.bf16.mxu0 %v3590_v60 }
 0x9ba   :  { %3227 = vmatpush1.bf16.msra.mxu0 %v3609_v2 }
 0x9bb   :  { %3252 = vmatprep.subr.bf16.mxu0 %v3376_v4 }
 0xa70   :  { %v1337_v12 = vpop.f32.mrb[16].mxu0 }
 0xa71   :  { %v1338_v17 = vadd.f32 %v1337_v12, %v1263_v61  ;;  %v2540_v18 = vpop.f32.mrb[17].mxu0 }
 0xa73   :  { %v1343_v20 = vadd.f32 %v1876_v13, %v1338_v17 }
 0xa75   :  { %3369 = vtanh.f32 %v1343_v20 }
 0xa7f   :  { %v3370_v23 = vpop.eup %3369 }
 0xa80   :  { %2574 = vmatmul.mubr.f32.vlgmr.msra.gmra.mrb[16].mxu1 %v3370_v23  ;;  %1482 = vmatmul.mubr.f32.vlgmr.msra.gmra.mrb[18].mxu0 %v3370_v23 }
 0xa81   :  { %3230 = vmatpush3.bf16.msra.mxu1 %v3503_v32  ;;  %2608 = vmatprep.mubr.msk.f32.mxu1 %vm3377_vm0, %v3375_v3 }
 0xa82   :  { %3231 = vmatprep.subr.bf16.mxu1 %v3376_v4  ;;  %3254 = vmatpush3.bf16.msra.mxu0 %v3651_v19 }
 0xa83   :  { %3255 = vmatprep.subr.bf16.mxu0 %v3376_v4  ;;  %2643 = vmatprep.mubr.msk.f32.mxu0 %vm3377_vm0, %v3375_v3 }
 0xa85   :  { %3233 = vmatpush3.bf16.msra.mxu1 %v3521_v38 }
 0xa86   :  { %3234 = vmatprep.subr.bf16.mxu1 %v3376_v4  ;;  %3257 = vmatpush3.bf16.msra.mxu0 %v3660_v24 }
 0xa87   :  { %3258 = vmatprep.subr.bf16.mxu0 %v3376_v4 }
 0xa89   :  { %3236 = vmatpush3.bf16.msra.mxu1 %v3549_v47 }
 0xa8a   :  { %3237 = vmatprep.subr.bf16.mxu1 %v3376_v4  ;;  %3260 = vmatpush3.bf16.msra.mxu0 %v3670_v27 }
 0xa8b   :  { %3261 = vmatprep.subr.bf16.mxu0 %v3376_v4 }
 0xa8d   :  { %3239 = vmatpush3.bf16.msra.mxu1 %v3577_v56 }
 0xa8e   :  { %3240 = vmatprep.subr.bf16.mxu1 %v3376_v4  ;;  %3263 = vmatpush3.bf16.msra.mxu0 %v3680_v30 }
 0xa8f   :  { %3264 = vmatprep.subr.bf16.mxu0 %v3376_v4 }
 0xa91   :  { %3242 = vmatpush3.bf16.msra.mxu1 %v3599_v63 }
 0xa92   :  { %3243 = vmatprep.subr.bf16.mxu1 %v3376_v4  ;;  %3266 = vmatpush3.bf16.msra.mxu0 %v3711_v43 }
 0xa93   :  { %3267 = vmatprep.subr.bf16.mxu0 %v3376_v4 }
 0xa95   :  { %3245 = vmatpush3.bf16.msra.mxu1 %v3613_v6 }
 0xa96   :  { %3246 = vmatprep.subr.bf16.mxu1 %v3376_v4  ;;  %3269 = vmatpush3.bf16.msra.mxu0 %v3721_v46 }
 0xa97   :  { %3270 = vmatprep.subr.bf16.mxu0 %v3376_v4 }
 0xa99   :  { %3248 = vmatpush3.bf16.msra.mxu1 %v3625_v11 }
 0xa9a   :  { %3249 = vmatprep.subr.bf16.mxu1 %v3376_v4  ;;  %3272 = vmatpush3.bf16.msra.mxu0 %v3731_v52 }
 0xa9b   :  { %3273 = vmatprep.subr.bf16.mxu0 %v3376_v4 }
 0xa9d   :  { %3251 = vmatpush3.bf16.msra.mxu1 %v3637_v14 }
 0xa9e   :  { %3277 = vmatprep.subr.bf16.mxu1 %v3424_v5  ;;  %3275 = vmatpush3.bf16.msra.mxu0 %v3740_v55 }
 0xa9f   :  { %3308 = vmatprep.subr.bf16.mxu0 %v3376_v4 }
 0xb53   :  { %v1411_v26 = vpop.f32.mrb[16].mxu1  ;;  %v1483_v28 = vpop.f32.mrb[18].mxu0 }
 0xb54   :  { %v1412_v29 = vadd.f32 %v3787_v7, %v1411_v26  ;;  %v2575_v34 = vpop.f32.mrb[17].mxu1  ;;  %v1485_v35 = vpop.f32.mrb[19].mxu0 }
 0xb55   :  { %v1490_v36 = vmul.f32 %v1878_v25, %v1485_v35 }
 0xb56   :  { %1877 = vst [vmem:[%s4185_s6 + $0x28] sm:$0xff] %v1412_v29 }
 0xb57   :  { %2609 = vmatmul.mubr.f32.vlgmr.msra.gmra.mrb[18].mxu1 %v1490_v36 }
 0xb58   :  { %3279 = vmatpush1.bf16.msra.mxu1 %v3435_v9  ;;  %1701 = vmatprep.mubr.f32.mxu1 %v3375_v3  ;;  %v1879_v9 = vld [vmem:[%s4183_s1 + $0x30] sm:$0xff] }
 0xb59   :  { %3281 = vmatprep.subr.bf16.mxu1 %v3437_v10 }
 0xb5c   :  { %3283 = vmatpush1.bf16.msra.mxu1 %v3453_v15 }
 0xb5d   :  { %3285 = vmatprep.subr.bf16.mxu1 %v3456_v16 }
 0xb60   :  { %3287 = vmatpush1.bf16.msra.mxu1 %v3471_v21 }
 0xb61   :  { %3289 = vmatprep.subr.bf16.mxu1 %v3474_v22 }
 0xb64   :  { %3291 = vmatpush1.bf16.msra.mxu1 %v3501_v31 }
 0xb65   :  { %3293 = vmatprep.subr.bf16.mxu1 %v3506_v33 }
 0xb68   :  { %3295 = vmatpush1.bf16.msra.mxu1 %v3531_v41 }
 0xb69   :  { %3297 = vmatprep.subr.bf16.mxu1 %v3534_v42  ;;  %v1882_v42 = vld [vmem:[%s4183_s1 + $0x38] sm:$0xff] }
 0xb6c   :  { %3299 = vmatpush1.bf16.msra.mxu1 %v3559_v50 }
 0xb6d   :  { %3301 = vmatprep.subr.bf16.mxu1 %v3562_v51 }
 0xb70   :  { %3303 = vmatpush1.bf16.msra.mxu1 %v3587_v59 }
 0xb71   :  { %3305 = vmatprep.subr.bf16.mxu1 %v3590_v60 }
 0xb74   :  { %3307 = vmatpush1.bf16.msra.mxu1 %v3609_v2 }
 0xb75   :  { %3332 = vmatprep.subr.bf16.mxu1 %v3376_v4 }
 0xc2a   :  { %v1557_v5 = vpop.f32.mrb[18].mxu1 }
 0xc2b   :  { %v1558_v10 = vadd.f32 %v1557_v5, %v1483_v28  ;;  %v2610_v15 = vpop.f32.mrb[19].mxu1 }
 0xc2d   :  { %v1563_v16 = vadd.f32 %v1879_v9, %v1558_v10 }
 0xc2f   :  { %3371 = vtanh.f32 %v1563_v16 }
 0xc39   :  { %v3372_v21 = vpop.eup %3371 }
 0xc3a   :  { %2644 = vmatmul.mubr.f32.vlgmr.msra.gmra.mrb[20].mxu0 %v3372_v21  ;;  %1702 = vmatmul.mubr.f32.vlgmr.msra.gmra.mrb[20].mxu1 %v3372_v21 }
 0xc3b   :  { %3310 = vmatpush3.bf16.msra.mxu0 %v3503_v32  ;;  %2678 = vmatprep.mubr.msk.f32.mxu0 %vm3377_vm0, %v3375_v3 }
 0xc3c   :  { %3311 = vmatprep.subr.bf16.mxu0 %v3376_v4  ;;  %3334 = vmatpush3.bf16.msra.mxu1 %v3651_v19 }
 0xc3d   :  { %3335 = vmatprep.subr.bf16.mxu1 %v3376_v4  ;;  %2713 = vmatprep.mubr.msk.f32.mxu1 %vm3377_vm0, %v3375_v3  ;;  %v1881_v3 = vld [vmem:[%s4182_s0 + $0x38] sm:$0xff] }
 0xc3f   :  { %3313 = vmatpush3.bf16.msra.mxu0 %v3521_v38 }
 0xc40   :  { %3314 = vmatprep.subr.bf16.mxu0 %v3376_v4  ;;  %3337 = vmatpush3.bf16.msra.mxu1 %v3660_v24 }
 0xc41   :  { %3338 = vmatprep.subr.bf16.mxu1 %v3376_v4 }
 0xc43   :  { %3316 = vmatpush3.bf16.msra.mxu0 %v3549_v47 }
 0xc44   :  { %3317 = vmatprep.subr.bf16.mxu0 %v3376_v4  ;;  %3340 = vmatpush3.bf16.msra.mxu1 %v3670_v27 }
 0xc45   :  { %3341 = vmatprep.subr.bf16.mxu1 %v3376_v4 }
 0xc47   :  { %3319 = vmatpush3.bf16.msra.mxu0 %v3577_v56 }
 0xc48   :  { %3320 = vmatprep.subr.bf16.mxu0 %v3376_v4  ;;  %3343 = vmatpush3.bf16.msra.mxu1 %v3680_v30 }
 0xc49   :  { %3344 = vmatprep.subr.bf16.mxu1 %v3376_v4 }
 0xc4b   :  { %3322 = vmatpush3.bf16.msra.mxu0 %v3599_v63 }
 0xc4c   :  { %3323 = vmatprep.subr.bf16.mxu0 %v3376_v4  ;;  %3346 = vmatpush3.bf16.msra.mxu1 %v3711_v43 }
 0xc4d   :  { %3347 = vmatprep.subr.bf16.mxu1 %v3376_v4 }
 0xc4f   :  { %3325 = vmatpush3.bf16.msra.mxu0 %v3613_v6 }
 0xc50   :  { %3326 = vmatprep.subr.bf16.mxu0 %v3376_v4  ;;  %3349 = vmatpush3.bf16.msra.mxu1 %v3721_v46 }
 0xc51   :  { %3350 = vmatprep.subr.bf16.mxu1 %v3376_v4 }
 0xc53   :  { %3328 = vmatpush3.bf16.msra.mxu0 %v3625_v11 }
 0xc54   :  { %3329 = vmatprep.subr.bf16.mxu0 %v3376_v4  ;;  %3352 = vmatpush3.bf16.msra.mxu1 %v3731_v52 }
 0xc55   :  { %3353 = vmatprep.subr.bf16.mxu1 %v3376_v4 }
 0xc57   :  { %3331 = vmatpush3.bf16.msra.mxu0 %v3637_v14 }
 0xc58   :  { %3355 = vmatpush3.bf16.msra.mxu1 %v3740_v55 }
 0xd0d   :  { %v1631_v22 = vpop.f32.mrb[20].mxu0  ;;  %v1703_v31 = vpop.f32.mrb[20].mxu1 }
 0xd0e   :  { %v1632_v32 = vadd.f32 %v3787_v7, %v1631_v22  ;;  %v2645_v33 = vpop.f32.mrb[21].mxu0  ;;  %v1705_v38 = vpop.f32.mrb[21].mxu1 }
 0xd0f   :  { %v1710_v41 = vmul.f32 %v1881_v3, %v1705_v38 }
 0xd10   :  { %1880 = vst [vmem:[%s4185_s6 + $0x30] sm:$0xff] %v1632_v32 }
 0xd11   :  { %2679 = vmatmul.mubr.f32.vlgmr.msra.gmra.mrb[22].mxu0 %v1710_v41 }
 0xde4   :  { %v1777_v4 = vpop.f32.mrb[22].mxu0 }
 0xde5   :  { %v1778_v47 = vadd.f32 %v1777_v4, %v1703_v31  ;;  %v2680_v50 = vpop.f32.mrb[23].mxu0 }
 0xde7   :  { %v1783_v51 = vadd.f32 %v1882_v42, %v1778_v47 }
 0xde9   :  { %3373 = vtanh.f32 %v1783_v51 }
 0xdf3   :  { %v3374_v56 = vpop.eup %3373 }
 0xdf4   :  { %2714 = vmatmul.mubr.f32.vlgmr.msra.gmra.mrb[22].mxu1 %v3374_v56 }
 0xec7   :  { %v1851_v59 = vpop.f32.mrb[22].mxu1 }
 0xec8   :  { %v1852_v60 = vadd.f32 %v3787_v7, %v1851_v59  ;;  %v2715_v63 = vpop.f32.mrb[23].mxu1 }
 0xeca   :  { %1883 = vst [vmem:[%s4185_s6 + $0x38] sm:$0xff] %v1852_v60 }

</bundles_post_ra>
